<compile_context>
chip_gen: v7x
topology: tpu7x:2x2x1
jax: 0.10.0
libtpu: 0.0.40
codegen_flags: <defaults>
</compile_context>

<pallas_src>
import functools

import jax
import jax.numpy as jnp
from jax.experimental import pallas as pl
from jax.experimental.pallas import tpu as pltpu

THRESHOLDS = (0.5, 0.6, 0.7, 0.8, 0.9)  # deterministic module "parameters"


def _wbp_kernel(need_m2_ref,            # SMEM (B*NJ,) int32  [scalar prefetch]
                boxj_ref,               # (1, 4, TJ)   column-tile box coords
                scorej_ref,             # (1, 1, TJ)   column-tile scores (score_j)
                mw_ref,                 # (1, T, TJ)   column-tile mask weights
                boxi_ref,               # (1, TI, 8)   packed rows [x1,y1,x2,y2,score,0,0,0]
                out_ref,                # (1, 1, TJ)
                m1_ref,                 # VMEM (1, TJ) f32 scratch: max IoU over "beating" rows
                m2_ref,                 # VMEM (1, TJ) f32 scratch: min IoU over "zero-beating" rows
                *, thresholds, approx_iou):
    ti = boxi_ref.shape[1]
    tj = boxj_ref.shape[2]
    i_step = pl.program_id(2)

    # ---- init accumulators at the first i chunk ----
    @pl.when(i_step == 0)
    def _():
        m1_ref[...] = jnp.full_like(m1_ref, -jnp.inf)
        m2_ref[...] = jnp.full_like(m2_ref, jnp.inf)

    # ---- column (j) side: lane-indexed ----
    box_j = boxj_ref[0]                                   # (4, TJ)
    x1r, y1r = box_j[0:1, :], box_j[1:2, :]
    x2r, y2r = box_j[2:3, :], box_j[3:4, :]
    area_r = (x2r - x1r) * (y2r - y1r)                    # (1, TJ)
    score_r = scorej_ref[0]                               # (1, TJ)

    # ---- row (i) side: sublane-indexed packed chunk ----
    pk = boxi_ref[0]                                      # (TI, 8)
    x1c, y1c = pk[:, 0:1], pk[:, 1:2]
    x2c, y2c = pk[:, 2:3], pk[:, 3:4]
    score_c = pk[:, 4:5]                                  # (TI, 1)
    area_c = (x2c - x1c) * (y2c - y1c)                    # (TI, 1)

    # ---- pairwise IoU tile iou[i, j] (torchvision box_iou) ----
    inter_w = jnp.maximum(jnp.minimum(x2c, x2r) - jnp.maximum(x1c, x1r), 0.0)
    inter_h = jnp.maximum(jnp.minimum(y2c, y2r) - jnp.maximum(y1c, y1r), 0.0)
    inter = inter_w * inter_h                             # (TI, TJ)
    denom = area_c + area_r - inter
    if approx_iou:
        iou = inter * pl.reciprocal(denom, approx=True)   # EUP slot, frees the VPU
    else:
        iou = inter / denom                               # bitwise parity with the reference

    # ---- global indices for the first-max tie break ----
    i_idx = i_step * ti + jax.lax.broadcasted_iota(jnp.int32, (ti, 1), 0)
    j_idx = pl.program_id(1) * tj + jax.lax.broadcasted_iota(jnp.int32, (1, tj), 1)
    i_lt_j = i_idx < j_idx                                # (TI, TJ)

    # Row i "beats" column j at a threshold iff iou >= thr AND
    #   (score_i > score_j) or (score_i == score_j and i < j).
    # Threshold-invariant, so one masked max-reduce covers all thresholds.
    beats = (score_c > score_r) | (i_lt_j & (score_c == score_r))
    m1_ref[...] = jnp.maximum(
        m1_ref[...],
        jnp.max(jnp.where(beats, iou, -jnp.inf), axis=0, keepdims=True))

    # Row i with iou < thr contributes value 0, which "beats" column j iff
    #   (0 > score_j) or (0 == score_j and i < j).
    # Only columns with score_j <= 0 can be affected; the host precomputes a
    # per-(b, j-tile) flag so the whole path is skipped for positive-score tiles.
    tile_id = pl.program_id(0) * pl.num_programs(1) + pl.program_id(1)

    @pl.when(need_m2_ref[tile_id] != 0)
    def _():
        zero_beats = (score_r < 0.0) | (i_lt_j & (score_r == 0.0))
        m2_ref[...] = jnp.minimum(
            m2_ref[...],
            jnp.min(jnp.where(zero_beats, iou, jnp.inf), axis=0, keepdims=True))

    # ---- finalize: threshold loop on (1, TJ) data, lane-dense store ----
    @pl.when(i_step == pl.num_programs(2) - 1)
    def _():
        m1 = m1_ref[...]
        m2 = m2_ref[...]
        mw = mw_ref[0]                                    # (T, TJ)
        acc = jnp.zeros((1, tj), dtype=jnp.float32)
        for t, thr in enumerate(thresholds):              # static, tiny loop
            pool = (m1 < thr) & (m2 >= thr)               # box j wins column j at thr
            acc = acc + jnp.where(pool, mw[t:t + 1, :].astype(jnp.float32), 0.0)
        out_ref[0] = acc.astype(out_ref.dtype)


def _vmem_capacity_bytes():
    try:
        return int(pltpu.get_tpu_info().vmem_capacity_bytes)
    except Exception:
        return 64 * 1024 * 1024    # conservative (v7x-sized) fallback


def _pick_tiles(n, b, big_vmem):
    """Pick (TJ lane tile, TI sublane chunk)."""
    if n % 128 != 0:
        # Irregular N: single full-array tile on both axes (block dim equal to
        # the full array dim is legal); same as the validated untiled path.
        return n, n
    # j (lane) tile: large enough to amortize per-grid-step overhead; 1024 only
    # on 128-MiB-VMEM chips (v5e/v6e), capped at 512 elsewhere (v7x: 64 MiB).
    tj_cands = (1024, 512, 256) if big_vmem else (512, 256)
    tj = 128
    for cand in tj_cands:
        if n % cand == 0:
            tj = cand
            break
    # v7x has 2 TensorCores: make sure there are >= 2 parallel (b, j) tiles.
    while tj > 128 and b * (n // tj) < 2:
        tj //= 2
    # i (sublane) chunk: bounds VMEM independently of N.
    ti = min(n, 512)
    while n % ti:
        ti //= 2
    return tj, ti


def weighted_box_pool(mask_weight, box, score, thresholds=THRESHOLDS, *,
                      tj=None, ti=None, approx_iou=True, vmem_limit_bytes=None):
    """Pallas-TPU WeightedBoxPool forward.  Boxes must have positive area."""
    B, T, N = mask_weight.shape
    assert box.shape == (B, 4, N)
    assert score.shape == (B, 1, N)
    assert T == len(thresholds)

    score = score.astype(box.dtype)

    big_vmem = _vmem_capacity_bytes() >= 96 * 1024 * 1024   # v5e/v6e: 128 MiB
    tj_d, ti_d = _pick_tiles(N, B, big_vmem)
    tj = tj_d if tj is None else tj
    ti = ti_d if ti is None else ti
    assert N % tj == 0 and N % ti == 0, "tile sizes must divide N"
    nj, ni = N // tj, N // ti
    if vmem_limit_bytes is None and big_vmem:
        vmem_limit_bytes = 64 * 1024 * 1024

    # Pack the row-side (i-axis) operands once in XLA (O(N) glue): one
    # contiguous (TI, 8) slab is streamed per i chunk instead of two
    # lane-sparse full-N buffers.
    packed = jnp.concatenate(
        [jnp.transpose(box, (0, 2, 1)),
         jnp.transpose(score, (0, 2, 1)),
         jnp.zeros((B, N, 3), box.dtype)], axis=2)           # (B, N, 8)

    # Per-(b, j-tile) flag: does any column of the tile have score <= 0?
    # If not, the m2 reduction is provably +inf and the kernel skips it.
    need_m2 = (jnp.min(score[:, 0, :].reshape(B, nj, tj), axis=2) <= 0.0)
    need_m2 = need_m2.astype(jnp.int32).reshape(B * nj)

    kernel = functools.partial(
        _wbp_kernel,
        thresholds=tuple(float(t) for t in thresholds),
        approx_iou=bool(approx_iou))

    grid_spec = pltpu.PrefetchScalarGridSpec(
        num_scalar_prefetch=1,
        grid=(B, nj, ni),
        in_specs=[
            pl.BlockSpec((1, 4, tj), lambda b, j, i, flags: (b, 0, j)),   # box, j tile
            pl.BlockSpec((1, 1, tj), lambda b, j, i, flags: (b, 0, j)),   # score, j tile
            pl.BlockSpec((1, T, tj), lambda b, j, i, flags: (b, 0, j)),   # mask_weight, j tile
            pl.BlockSpec((1, ti, 8), lambda b, j, i, flags: (b, i, 0)),   # packed i chunk
        ],
        out_specs=pl.BlockSpec((1, 1, tj), lambda b, j, i, flags: (b, 0, j)),
        scratch_shapes=[pltpu.VMEM((1, tj), jnp.float32),   # m1
                        pltpu.VMEM((1, tj), jnp.float32)],  # m2
    )
    return pl.pallas_call(
        kernel,
        out_shape=jax.ShapeDtypeStruct((B, 1, N), mask_weight.dtype),
        grid_spec=grid_spec,
        compiler_params=pltpu.CompilerParams(
            dimension_semantics=("parallel", "parallel", "arbitrary"),
            vmem_limit_bytes=vmem_limit_bytes,
        ),
    )(need_m2, box, score, mask_weight, packed)


def weighted_box_pool_ref(mask_weight, box, score, thresholds=THRESHOLDS):
    """Pure-JAX reference mirroring the PyTorch forward exactly."""
    boxes = jnp.transpose(box, (0, 2, 1))  # (B, N, 4)

    def pairwise_iou(bs):
        area = (bs[:, 2] - bs[:, 0]) * (bs[:, 3] - bs[:, 1])
        lt = jnp.maximum(bs[:, None, :2], bs[None, :, :2])
        rb = jnp.minimum(bs[:, None, 2:], bs[None, :, 2:])
        wh = jnp.clip(rb - lt, 0.0)
        inter = wh[..., 0] * wh[..., 1]
        return inter / (area[:, None] + area[None, :] - inter)

    iou = jax.vmap(pairwise_iou)(boxes)                          # (B, N, N)
    thr = jnp.asarray(thresholds, dtype=iou.dtype)
    iou_masks = (iou[..., None] >= thr).astype(jnp.float32)      # (B, N, N, T)
    sc = jnp.transpose(score, (0, 2, 1))[..., None]              # (B, N, 1, 1)
    adjc = iou_masks * sc
    max_idx = jnp.argmax(adjc, axis=1)                           # (B, N, T)
    N = box.shape[2]
    box_idx = jnp.arange(N)[None, :, None]
    pool_masks = (max_idx == box_idx).astype(mask_weight.dtype)  # (B, N, T)
    pool_masks = jnp.transpose(pool_masks, (0, 2, 1))            # (B, T, N)
    return jnp.sum(pool_masks * mask_weight, axis=1, keepdims=True)


if __name__ == "__main__":
    key = jax.random.PRNGKey(0)
    B, T = 2, len(THRESHOLDS)

    def make_inputs(n, k):
        k1, k2, k3, k4 = jax.random.split(k, 4)
        xy = jax.random.uniform(k1, (B, 2, n), jnp.float32, 0.0, 10.0)
        wh = jax.random.uniform(k2, (B, 2, n), jnp.float32, 1.0, 6.0)
        bx = jnp.concatenate([xy, xy + wh], axis=1)                  # valid boxes
        sc = jax.random.uniform(k3, (B, 1, n), jnp.float32)
        mw = jax.random.uniform(k4, (B, T, n), jnp.float32)
        return mw, bx, sc

    def approx_check(out_a, ref):
        # Approx-reciprocal decisions can flip only when an IoU extremum lands
        # within rcp error of a threshold -> demand near-total agreement.
        assert bool(jnp.all(jnp.isfinite(out_a)))
        agree = float(jnp.mean((jnp.abs(out_a - ref) <= 1e-3).astype(jnp.float32)))
        assert agree >= 0.9, agree

    # Config 1: multi-tile on both grid axes (N=512, TJ=TI=128); also exercise
    # the tie-break, zero-score and negative-score code paths.
    mw, box, score = make_inputs(512, jax.random.fold_in(key, 512))
    box = box.at[:, :, 5].set(box[:, :, 9])                  # identical boxes 5 and 9
    score = score.at[:, 0, 5].set(score[:, 0, 9])            # exact score tie (5 < 9 wins)
    score = score.at[0, 0, 7].set(0.0)                       # zero-score column
    score = score.at[1, 0, 300].set(-0.25)                   # negative-score column
    ref = weighted_box_pool_ref(mw, box, score)
    out = jax.block_until_ready(
        weighted_box_pool(mw, box, score, tj=128, ti=128, approx_iou=False))
    assert out.shape == (B, 1, 512)
    assert jnp.allclose(out, ref, atol=1e-5, rtol=1e-5)
    out_a = jax.block_until_ready(
        weighted_box_pool(mw, box, score, tj=128, ti=128))   # default approx path
    approx_check(out_a, ref)

    # Configs 2/3: default (auto) tiling, exact and approx IoU.
    for n in (256, 128):
        mw, box, score = make_inputs(n, jax.random.fold_in(key, n))
        ref = weighted_box_pool_ref(mw, box, score)
        out = jax.block_until_ready(weighted_box_pool(mw, box, score, approx_iou=False))
        assert out.shape == (B, 1, n)
        assert jnp.allclose(out, ref, atol=1e-5, rtol=1e-5), n
        out_a = jax.block_until_ready(weighted_box_pool(mw, box, score))
        approx_check(out_a, ref)

    print("KERNEL_OK")
</pallas_src>

<mosaic_0001>
module attributes {stable_mosaic.version = 11 : i64} {
  func.func @_wbp_kernel(%arg0: i32, %arg1: i32, %arg2: i32, %arg3: memref<8xi32, #tpu.memory_space<smem>>, %arg4: memref<1x4x128xf32, #tpu.memory_space<vmem>>, %arg5: memref<1x1x128xf32, #tpu.memory_space<vmem>>, %arg6: memref<1x5x128xf32, #tpu.memory_space<vmem>>, %arg7: memref<1x128x8xf32, #tpu.memory_space<vmem>>, %arg8: memref<1x1x128xf32, #tpu.memory_space<vmem>>, %arg9: memref<1x128xf32, #tpu.memory_space<vmem>>, %arg10: memref<1x128xf32, #tpu.memory_space<vmem>>) attributes {dimension_semantics = [#tpu.dimension_semantics<parallel>, #tpu.dimension_semantics<parallel>, #tpu.dimension_semantics<arbitrary>], iteration_bounds = array<i64: 2, 4, 4>, scalar_prefetch = 1 : i64, scratch_operands = 2 : i64, tpu.core_type = #tpu.core_type<tc>, window_params = [{transform_indices = @transform_0, window_bounds = array<i64: 1, 4, 128>}, {transform_indices = @transform_1, window_bounds = array<i64: 1, 1, 128>}, {transform_indices = @transform_2, window_bounds = array<i64: 1, 5, 128>}, {transform_indices = @transform_3, window_bounds = array<i64: 1, 128, 8>}, {transform_indices = @transform_4, window_bounds = array<i64: 1, 1, 128>}]} {
    %c0_i32 = arith.constant 0 : i32
    %0 = arith.cmpi eq, %arg2, %c0_i32 : i32
    %1 = arith.extui %0 : i1 to i32
    %c0_i32_0 = arith.constant 0 : i32
    %2 = arith.cmpi ne, %1, %c0_i32_0 : i32
    scf.if %2 {
      %cst_20 = arith.constant 0xFF800000 : f32
      %84 = vector.broadcast %cst_20 : f32 to vector<1x128xf32>
      %c0_21 = arith.constant 0 : index
      %c0_22 = arith.constant 0 : index
      %85 = vector.load %arg9[%c0_21, %c0_22] : memref<1x128xf32, #tpu.memory_space<vmem>>, vector<1x128xf32>
      tpu.vector_store %arg9[%c0_21, %c0_22], %84 {strides = array<i32>} : memref<1x128xf32, #tpu.memory_space<vmem>>, vector<1x128xf32>,
      %cst_23 = arith.constant 0x7F800000 : f32
      %86 = vector.broadcast %cst_23 : f32 to vector<1x128xf32>
      %c0_24 = arith.constant 0 : index
      %c0_25 = arith.constant 0 : index
      %87 = vector.load %arg10[%c0_24, %c0_25] : memref<1x128xf32, #tpu.memory_space<vmem>>, vector<1x128xf32>
      tpu.vector_store %arg10[%c0_24, %c0_25], %86 {strides = array<i32>} : memref<1x128xf32, #tpu.memory_space<vmem>>, vector<1x128xf32>,
    } else {
    }
    %c0 = arith.constant 0 : index
    %c0_1 = arith.constant 0 : index
    %c0_2 = arith.constant 0 : index
    %3 = vector.load %arg4[%c0, %c0_1, %c0_2] : memref<1x4x128xf32, #tpu.memory_space<vmem>>, vector<1x4x128xf32>
    %4 = vector.shape_cast %3 : vector<1x4x128xf32> to vector<4x128xf32>
    %5 = vector.extract_strided_slice %4 {offsets = [0, 0], sizes = [1, 128], strides = [1, 1]} : vector<4x128xf32> to vector<1x128xf32>
    %6 = vector.extract_strided_slice %4 {offsets = [1, 0], sizes = [1, 128], strides = [1, 1]} : vector<4x128xf32> to vector<1x128xf32>
    %7 = vector.extract_strided_slice %4 {offsets = [2, 0], sizes = [1, 128], strides = [1, 1]} : vector<4x128xf32> to vector<1x128xf32>
    %8 = vector.extract_strided_slice %4 {offsets = [3, 0], sizes = [1, 128], strides = [1, 1]} : vector<4x128xf32> to vector<1x128xf32>
    %9 = arith.subf %7, %5 : vector<1x128xf32>
    %10 = arith.subf %8, %6 : vector<1x128xf32>
    %11 = arith.mulf %9, %10 : vector<1x128xf32>
    %c0_3 = arith.constant 0 : index
    %c0_4 = arith.constant 0 : index
    %c0_5 = arith.constant 0 : index
    %12 = vector.load %arg5[%c0_3, %c0_4, %c0_5] : memref<1x1x128xf32, #tpu.memory_space<vmem>>, vector<1x1x128xf32>
    %13 = vector.shape_cast %12 : vector<1x1x128xf32> to vector<1x128xf32>
    %c0_6 = arith.constant 0 : index
    %c0_7 = arith.constant 0 : index
    %c0_8 = arith.constant 0 : index
    %14 = vector.load %arg7[%c0_6, %c0_7, %c0_8] : memref<1x128x8xf32, #tpu.memory_space<vmem>>, vector<1x128x8xf32>
    %15 = vector.shape_cast %14 : vector<1x128x8xf32> to vector<128x8xf32>
    %16 = vector.extract_strided_slice %15 {offsets = [0, 0], sizes = [128, 1], strides = [1, 1]} : vector<128x8xf32> to vector<128x1xf32>
    %17 = vector.extract_strided_slice %15 {offsets = [0, 1], sizes = [128, 1], strides = [1, 1]} : vector<128x8xf32> to vector<128x1xf32>
    %18 = vector.extract_strided_slice %15 {offsets = [0, 2], sizes = [128, 1], strides = [1, 1]} : vector<128x8xf32> to vector<128x1xf32>
    %19 = vector.extract_strided_slice %15 {offsets = [0, 3], sizes = [128, 1], strides = [1, 1]} : vector<128x8xf32> to vector<128x1xf32>
    %20 = vector.extract_strided_slice %15 {offsets = [0, 4], sizes = [128, 1], strides = [1, 1]} : vector<128x8xf32> to vector<128x1xf32>
    %21 = arith.subf %18, %16 : vector<128x1xf32>
    %22 = arith.subf %19, %17 : vector<128x1xf32>
    %23 = arith.mulf %21, %22 : vector<128x1xf32>
    %24 = vector.broadcast %18 : vector<128x1xf32> to vector<128x128xf32>
    %25 = vector.broadcast %7 : vector<1x128xf32> to vector<128x128xf32>
    %26 = arith.minimumf %24, %25 : vector<128x128xf32>
    %27 = vector.broadcast %16 : vector<128x1xf32> to vector<128x128xf32>
    %28 = vector.broadcast %5 : vector<1x128xf32> to vector<128x128xf32>
    %29 = arith.maximumf %27, %28 : vector<128x128xf32>
    %30 = arith.subf %26, %29 : vector<128x128xf32>
    %cst = arith.constant 0.000000e+00 : f32
    %31 = vector.broadcast %cst : f32 to vector<128x128xf32>
    %32 = arith.maximumf %30, %31 : vector<128x128xf32>
    %33 = vector.broadcast %19 : vector<128x1xf32> to vector<128x128xf32>
    %34 = vector.broadcast %8 : vector<1x128xf32> to vector<128x128xf32>
    %35 = arith.minimumf %33, %34 : vector<128x128xf32>
    %36 = vector.broadcast %17 : vector<128x1xf32> to vector<128x128xf32>
    %37 = vector.broadcast %6 : vector<1x128xf32> to vector<128x128xf32>
    %38 = arith.maximumf %36, %37 : vector<128x128xf32>
    %39 = arith.subf %35, %38 : vector<128x128xf32>
    %cst_9 = arith.constant 0.000000e+00 : f32
    %40 = vector.broadcast %cst_9 : f32 to vector<128x128xf32>
    %41 = arith.maximumf %39, %40 : vector<128x128xf32>
    %42 = arith.mulf %32, %41 : vector<128x128xf32>
    %43 = vector.broadcast %23 : vector<128x1xf32> to vector<128x128xf32>
    %44 = vector.broadcast %11 : vector<1x128xf32> to vector<128x128xf32>
    %45 = arith.addf %43, %44 : vector<128x128xf32>
    %46 = arith.subf %45, %42 : vector<128x128xf32>
    %47 = arith.divf %42, %46 : vector<128x128xf32>
    %c128_i32 = arith.constant 128 : i32
    %48 = arith.muli %arg2, %c128_i32 : i32
    %49 = tpu.iota {dimensions = array<i32: 0>} : vector<128x1xi32>
    %50 = vector.broadcast %48 : i32 to vector<128x1xi32>
    %51 = arith.addi %50, %49 : vector<128x1xi32>
    %c128_i32_10 = arith.constant 128 : i32
    %52 = arith.muli %arg1, %c128_i32_10 : i32
    %53 = tpu.iota {dimensions = array<i32: 1>} : vector<1x128xi32>
    %54 = vector.broadcast %52 : i32 to vector<1x128xi32>
    %55 = arith.addi %54, %53 : vector<1x128xi32>
    %56 = vector.broadcast %51 : vector<128x1xi32> to vector<128x128xi32>
    %57 = vector.broadcast %55 : vector<1x128xi32> to vector<128x128xi32>
    %58 = arith.cmpi slt, %56, %57 : vector<128x128xi32>
    %59 = vector.broadcast %20 : vector<128x1xf32> to vector<128x128xf32>
    %60 = vector.broadcast %13 : vector<1x128xf32> to vector<128x128xf32>
    %61 = arith.cmpf ogt, %59, %60 : vector<128x128xf32>
    %62 = vector.broadcast %20 : vector<128x1xf32> to vector<128x128xf32>
    %63 = vector.broadcast %13 : vector<1x128xf32> to vector<128x128xf32>
    %64 = arith.cmpf oeq, %62, %63 : vector<128x128xf32>
    %65 = arith.andi %58, %64 : vector<128x128xi1>
    %66 = arith.ori %61, %65 : vector<128x128xi1>
    %c0_11 = arith.constant 0 : index
    %c0_12 = arith.constant 0 : index
    %67 = vector.load %arg9[%c0_11, %c0_12] : memref<1x128xf32, #tpu.memory_space<vmem>>, vector<1x128xf32>
    %cst_13 = arith.constant 0xFF800000 : f32
    %68 = vector.broadcast %cst_13 : f32 to vector<128x128xf32>
    %69 = arith.select %66, %47, %68 : vector<128x128xi1>, vector<128x128xf32>
    %cst_14 = arith.constant dense<0xFF800000> : vector<128xf32>
    %70 = vector.multi_reduction <maximumf>, %69, %cst_14 [0] : vector<128x128xf32> to vector<128xf32>
    %71 = vector.shape_cast %70 : vector<128xf32> to vector<1x128xf32>
    %72 = arith.maximumf %67, %71 : vector<1x128xf32>
    %c0_15 = arith.constant 0 : index
    %c0_16 = arith.constant 0 : index
    %73 = vector.load %arg9[%c0_15, %c0_16] : memref<1x128xf32, #tpu.memory_space<vmem>>, vector<1x128xf32>
    tpu.vector_store %arg9[%c0_15, %c0_16], %72 {strides = array<i32>} : memref<1x128xf32, #tpu.memory_space<vmem>>, vector<1x128xf32>,
    %c4_i32 = arith.constant 4 : i32
    %74 = arith.muli %arg0, %c4_i32 : i32
    %75 = arith.addi %74, %arg1 : i32
    %76 = arith.index_cast %75 : i32 to index
    %77 = memref.load %arg3[%76] : memref<8xi32, #tpu.memory_space<smem>>
    %c0_i32_17 = arith.constant 0 : i32
    %78 = arith.cmpi ne, %77, %c0_i32_17 : i32
    %79 = arith.extui %78 : i1 to i32
    %c0_i32_18 = arith.constant 0 : i32
    %80 = arith.cmpi ne, %79, %c0_i32_18 : i32
    scf.if %80 {
      %cst_20 = arith.constant 0.000000e+00 : f32
      %84 = vector.broadcast %cst_20 : f32 to vector<1x128xf32>
      %85 = arith.cmpf olt, %13, %84 : vector<1x128xf32>
      %cst_21 = arith.constant 0.000000e+00 : f32
      %86 = vector.broadcast %cst_21 : f32 to vector<1x128xf32>
      %87 = arith.cmpf oeq, %13, %86 : vector<1x128xf32>
      %88 = vector.broadcast %87 : vector<1x128xi1> to vector<128x128xi1>
      %89 = arith.andi %58, %88 : vector<128x128xi1>
      %90 = vector.broadcast %85 : vector<1x128xi1> to vector<128x128xi1>
      %91 = arith.ori %90, %89 : vector<128x128xi1>
      %c0_22 = arith.constant 0 : index
      %c0_23 = arith.constant 0 : index
      %92 = vector.load %arg10[%c0_22, %c0_23] : memref<1x128xf32, #tpu.memory_space<vmem>>, vector<1x128xf32>
      %cst_24 = arith.constant 0x7F800000 : f32
      %93 = vector.broadcast %cst_24 : f32 to vector<128x128xf32>
      %94 = arith.select %91, %47, %93 : vector<128x128xi1>, vector<128x128xf32>
      %cst_25 = arith.constant dense<0x7F800000> : vector<128xf32>
      %95 = vector.multi_reduction <minimumf>, %94, %cst_25 [0] : vector<128x128xf32> to vector<128xf32>
      %96 = vector.shape_cast %95 : vector<128xf32> to vector<1x128xf32>
      %97 = arith.minimumf %92, %96 : vector<1x128xf32>
      %c0_26 = arith.constant 0 : index
      %c0_27 = arith.constant 0 : index
      %98 = vector.load %arg10[%c0_26, %c0_27] : memref<1x128xf32, #tpu.memory_space<vmem>>, vector<1x128xf32>
      tpu.vector_store %arg10[%c0_26, %c0_27], %97 {strides = array<i32>} : memref<1x128xf32, #tpu.memory_space<vmem>>, vector<1x128xf32>,
    } else {
    }
    %c3_i32 = arith.constant 3 : i32
    %81 = arith.cmpi eq, %arg2, %c3_i32 : i32
    %82 = arith.extui %81 : i1 to i32
    %c0_i32_19 = arith.constant 0 : i32
    %83 = arith.cmpi ne, %82, %c0_i32_19 : i32
    scf.if %83 {
      %c0_20 = arith.constant 0 : index
      %c0_21 = arith.constant 0 : index
      %84 = vector.load %arg9[%c0_20, %c0_21] : memref<1x128xf32, #tpu.memory_space<vmem>>, vector<1x128xf32>
      %c0_22 = arith.constant 0 : index
      %c0_23 = arith.constant 0 : index
      %85 = vector.load %arg10[%c0_22, %c0_23] : memref<1x128xf32, #tpu.memory_space<vmem>>, vector<1x128xf32>
      %c0_24 = arith.constant 0 : index
      %c0_25 = arith.constant 0 : index
      %c0_26 = arith.constant 0 : index
      %86 = vector.load %arg6[%c0_24, %c0_25, %c0_26] : memref<1x5x128xf32, #tpu.memory_space<vmem>>, vector<1x5x128xf32>
      %87 = vector.shape_cast %86 : vector<1x5x128xf32> to vector<5x128xf32>
      %cst_27 = arith.constant 0.000000e+00 : f32
      %88 = vector.broadcast %cst_27 : f32 to vector<1x128xf32>
      %cst_28 = arith.constant 5.000000e-01 : f32
      %89 = vector.broadcast %cst_28 : f32 to vector<1x128xf32>
      %90 = arith.cmpf olt, %84, %89 : vector<1x128xf32>
      %cst_29 = arith.constant 5.000000e-01 : f32
      %91 = vector.broadcast %cst_29 : f32 to vector<1x128xf32>
      %92 = arith.cmpf oge, %85, %91 : vector<1x128xf32>
      %93 = arith.andi %90, %92 : vector<1x128xi1>
      %94 = vector.extract_strided_slice %87 {offsets = [0, 0], sizes = [1, 128], strides = [1, 1]} : vector<5x128xf32> to vector<1x128xf32>
      %cst_30 = arith.constant 0.000000e+00 : f32
      %95 = vector.broadcast %cst_30 : f32 to vector<1x128xf32>
      %96 = arith.select %93, %94, %95 : vector<1x128xi1>, vector<1x128xf32>
      %97 = arith.addf %88, %96 : vector<1x128xf32>
      %cst_31 = arith.constant 6.000000e-01 : f32
      %98 = vector.broadcast %cst_31 : f32 to vector<1x128xf32>
      %99 = arith.cmpf olt, %84, %98 : vector<1x128xf32>
      %cst_32 = arith.constant 6.000000e-01 : f32
      %100 = vector.broadcast %cst_32 : f32 to vector<1x128xf32>
      %101 = arith.cmpf oge, %85, %100 : vector<1x128xf32>
      %102 = arith.andi %99, %101 : vector<1x128xi1>
      %103 = vector.extract_strided_slice %87 {offsets = [1, 0], sizes = [1, 128], strides = [1, 1]} : vector<5x128xf32> to vector<1x128xf32>
      %cst_33 = arith.constant 0.000000e+00 : f32
      %104 = vector.broadcast %cst_33 : f32 to vector<1x128xf32>
      %105 = arith.select %102, %103, %104 : vector<1x128xi1>, vector<1x128xf32>
      %106 = arith.addf %97, %105 : vector<1x128xf32>
      %cst_34 = arith.constant 0.699999988 : f32
      %107 = vector.broadcast %cst_34 : f32 to vector<1x128xf32>
      %108 = arith.cmpf olt, %84, %107 : vector<1x128xf32>
      %cst_35 = arith.constant 0.699999988 : f32
      %109 = vector.broadcast %cst_35 : f32 to vector<1x128xf32>
      %110 = arith.cmpf oge, %85, %109 : vector<1x128xf32>
      %111 = arith.andi %108, %110 : vector<1x128xi1>
      %112 = vector.extract_strided_slice %87 {offsets = [2, 0], sizes = [1, 128], strides = [1, 1]} : vector<5x128xf32> to vector<1x128xf32>
      %cst_36 = arith.constant 0.000000e+00 : f32
      %113 = vector.broadcast %cst_36 : f32 to vector<1x128xf32>
      %114 = arith.select %111, %112, %113 : vector<1x128xi1>, vector<1x128xf32>
      %115 = arith.addf %106, %114 : vector<1x128xf32>
      %cst_37 = arith.constant 8.000000e-01 : f32
      %116 = vector.broadcast %cst_37 : f32 to vector<1x128xf32>
      %117 = arith.cmpf olt, %84, %116 : vector<1x128xf32>
      %cst_38 = arith.constant 8.000000e-01 : f32
      %118 = vector.broadcast %cst_38 : f32 to vector<1x128xf32>
      %119 = arith.cmpf oge, %85, %118 : vector<1x128xf32>
      %120 = arith.andi %117, %119 : vector<1x128xi1>
      %121 = vector.extract_strided_slice %87 {offsets = [3, 0], sizes = [1, 128], strides = [1, 1]} : vector<5x128xf32> to vector<1x128xf32>
      %cst_39 = arith.constant 0.000000e+00 : f32
      %122 = vector.broadcast %cst_39 : f32 to vector<1x128xf32>
      %123 = arith.select %120, %121, %122 : vector<1x128xi1>, vector<1x128xf32>
      %124 = arith.addf %115, %123 : vector<1x128xf32>
      %cst_40 = arith.constant 0.899999976 : f32
      %125 = vector.broadcast %cst_40 : f32 to vector<1x128xf32>
      %126 = arith.cmpf olt, %84, %125 : vector<1x128xf32>
      %cst_41 = arith.constant 0.899999976 : f32
      %127 = vector.broadcast %cst_41 : f32 to vector<1x128xf32>
      %128 = arith.cmpf oge, %85, %127 : vector<1x128xf32>
      %129 = arith.andi %126, %128 : vector<1x128xi1>
      %130 = vector.extract_strided_slice %87 {offsets = [4, 0], sizes = [1, 128], strides = [1, 1]} : vector<5x128xf32> to vector<1x128xf32>
      %cst_42 = arith.constant 0.000000e+00 : f32
      %131 = vector.broadcast %cst_42 : f32 to vector<1x128xf32>
      %132 = arith.select %129, %130, %131 : vector<1x128xi1>, vector<1x128xf32>
      %133 = arith.addf %124, %132 : vector<1x128xf32>
      %c0_43 = arith.constant 0 : index
      %c0_44 = arith.constant 0 : index
      %c0_45 = arith.constant 0 : index
      %134 = vector.load %arg8[%c0_43, %c0_44, %c0_45] : memref<1x1x128xf32, #tpu.memory_space<vmem>>, vector<1x1x128xf32>
      %135 = vector.shape_cast %134 : vector<1x1x128xf32> to vector<1x128xf32>
      %136 = vector.shape_cast %133 : vector<1x128xf32> to vector<1x1x128xf32>
      tpu.vector_store %arg8[%c0_43, %c0_44, %c0_45], %136 {strides = array<i32>} : memref<1x1x128xf32, #tpu.memory_space<vmem>>, vector<1x1x128xf32>,
    } else {
    }
    return
  }
  func.func @transform_0(%arg0: i32, %arg1: i32, %arg2: i32, %arg3: memref<8xi32, #tpu.memory_space<smem>>) -> (i32, i32, i32) {
    %c0_i32 = arith.constant 0 : i32
    %c0_i32_0 = arith.constant 0 : i32
    return %arg0, %c0_i32, %arg1 : i32, i32, i32
  }
  func.func @transform_1(%arg0: i32, %arg1: i32, %arg2: i32, %arg3: memref<8xi32, #tpu.memory_space<smem>>) -> (i32, i32, i32) {
    %c0_i32 = arith.constant 0 : i32
    %c0_i32_0 = arith.constant 0 : i32
    return %arg0, %c0_i32, %arg1 : i32, i32, i32
  }
  func.func @transform_2(%arg0: i32, %arg1: i32, %arg2: i32, %arg3: memref<8xi32, #tpu.memory_space<smem>>) -> (i32, i32, i32) {
    %c0_i32 = arith.constant 0 : i32
    %c0_i32_0 = arith.constant 0 : i32
    return %arg0, %c0_i32, %arg1 : i32, i32, i32
  }
  func.func @transform_3(%arg0: i32, %arg1: i32, %arg2: i32, %arg3: memref<8xi32, #tpu.memory_space<smem>>) -> (i32, i32, i32) {
    %c0_i32 = arith.constant 0 : i32
    %c0_i32_0 = arith.constant 0 : i32
    return %arg0, %arg2, %c0_i32 : i32, i32, i32
  }
  func.func @transform_4(%arg0: i32, %arg1: i32, %arg2: i32, %arg3: memref<8xi32, #tpu.memory_space<smem>>) -> (i32, i32, i32) {
    %c0_i32 = arith.constant 0 : i32
    %c0_i32_0 = arith.constant 0 : i32
    return %arg0, %c0_i32, %arg1 : i32, i32, i32
  }
}

</mosaic_0001>

<bundles_post_ra>
// kernel: tpu_custom_call.1
= control target key start
LH: loop header
LB: loop body
LE: loop exit
PB: predicated region body
PF: predicated region fallthrough
CT: control target
= control target key end

     0   :  { %s3299_s0 = inlined_call_operand.vmem [shape: s32[8], index: 0, kind: input, shape index: {}]   ;;  %s3300_s1 = inlined_call_operand.vmem [shape: f32[2,4,512], index: 1, kind: input, shape index: {}]   ;;  %s3301_s2 = inlined_call_operand.vmem [shape: f32[2,1,512], index: 2, kind: input, shape index: {}]   ;;  %s3302_s3 = inlined_call_operand.vmem [shape: f32[2,5,512], index: 3, kind: input, shape index: {}]   ;;  %s3303_s4 = inlined_call_operand.vmem [shape: f32[2,512,8], index: 4, kind: input, shape index: {}]   ;;  %s3304_s5 = inlined_call_operand.hbm [shape: f32[2,1,512], index: 5, kind: output, shape index: {}]  }
   0x1   :  { %s10_s20 = sshll.u32 %s3299_s0, 4  ;;  %s11_s20 = int_to_ptr.vmem [resolvable:$true] %s10_s20 }
   0x2   :  { %s1798_s21 = scalar_lea.vmem %s11_s20, 16  ;;  %p1803_p1 = scmp.lt.s32.totalorder %s11_s20, %s11_s20 }
   0x3   :  { %p1799_p0 = scmp.ne.s32.totalorder %s11_s20, %s1798_s21  ;;  %p1804_p2 = scmp.lt.s32.totalorder %s1798_s21, %s1798_s21 }
   0x5   :  { %p1805_p3 = por %p1804_p2, %p1803_p1 }
   0x7   :  { %p1806_p4 = pnand %p1805_p3, %p1799_p0 }
   0x9   :  { %1809 = shalt.err (!%p1806_p4)  }
   0xa   :  { %s1924_s22 = smov [#allocation5]  }
   0xb   :  { %13 = dma.vmem_to_smem %s11_s20, 16, %s1924_s22, [#allocation4] }
   0xc   :  { %1878 = dma.done.wait [#allocation4], 16 }
   0xd   :  { %1879 = vsyncadd [#allocation4], 4294967280 }
   0xe   :  { %15 = sfence }
   0xf   :  { %16 = vsyncpa [#allocation7], 0 }
  0x10   :  { %18 = vsyncpa [#allocation7 + $0x1], 0  ;;  %s1970_s23 = smov 0   ;;  %s1972_s24 = smov 0  }
  0x11   :  { %s1974_s0 = smov 0   ;;  %s1976_s25 = smov 0  }
  0x12   :  { %s1978_s26 = smov 0   ;;  %s1980_s27 = smov 0  }
  0x13   :  { %s1982_s28 = smov 0   ;;  %s1984_s29 = smov 0  }
  0x14   :  { %s1986_s30 = smov 0   ;;  %s1988_s6 = smov 0  }
  0x15 LB: > { %3321 = sst [smem:[#allocation10_spill]] %s1894_s0  ;;  %s1631_s7 = sadd.s32 4294967295, %s1922_s6   ;;  %s1922_s6 = sphi %s1988_s6, %s24_s6   ;;  %s1918_s30 = sphi %s1986_s30, %s3413_s30   ;;  %s1914_s29 = sphi %s1984_s29, %s3412_s29   ;;  %s1910_s28 = sphi %s1982_s28, %s3411_s28   ;;  %s1906_s27 = sphi %s1980_s27, %s3410_s27   ;;  %s1902_s26 = sphi %s1978_s26, %s3409_s26   ;;  %s1898_s25 = sphi %s1976_s25, %s3408_s25   ;;  %s1894_s0 = sphi %s1974_s0, %s3407_s0   ;;  %s1890_s24 = sphi %s1972_s24, %s3415_s24   ;;  %s1886_s23 = sphi %s1970_s23, %s3414_s23  }
  0x16   : > { %3322 = sst [smem:[#allocation11_spill]] %s1910_s28  ;;  %s1632_s8 = sadd.s32 4294967294, %s1922_s6  }
  0x17   : > { %3323 = sst [smem:[#allocation12_spill]] %s1914_s29  ;;  %s36_s9 = sadd.s32 1, %s1910_s28 }
  0x18   : > { %3324 = sst [smem:[#allocation13_spill]] %s1918_s30  ;;  %p37_p5 = scmp.ge.s32.totalorder %s36_s9, 4 }
  0x19   : > { %s39_s10 = sadd.s32 1, %s1914_s29  ;;  %s43_s11 = sadd.s32 1, %s1918_s30 }
  0x1a   : > { %p174_p6 = scmp.ne.s32.totalorder %s1894_s0, %s1890_s24  ;;  %s3417_s9 = smov (%p37_p5, %s36_s9), 0 }
  0x1b   : > { %3325 = sst [smem:[#allocation14_spill]] %s3417_s9  ;;  %s3419_s10 = smov (!%p37_p5, %s39_s10), %s1914_s29 }
  0x1c   : > { %p175_p7 = scmp.eq.s32.totalorder %s1631_s7, 31  ;;  %p180_p8 = scmp.ne.s32.totalorder %s1890_s24, %s1886_s23 }
  0x1d   : > { %p41_p9 = scmp.ge.s32.totalorder %s3419_s10, 4  ;;  %p181_p10 = scmp.eq.s32.totalorder %s1632_s8, 31 }
  0x1e   : > { %p2032_p11 = por %p175_p7, %p174_p6  ;;  %p1635_p13 = scmp.ge.s32.totalorder %s1922_s6, 1 }
  0x1f   : > { %s3421_s10 = smov (%p41_p9, %s3419_s10), 0  ;;  %s3423_s11 = smov (!%p41_p9, %s43_s11), %s1918_s30 }
  0x20   : > { %3327 = sst [smem:[#allocation15_spill]] %s3421_s10  ;;  %p2039_p12 = por %p181_p10, %p180_p8 }
  0x21   : > { %p45_p0 = scmp.ge.s32.totalorder %s3423_s11, 2  ;;  %p244_p1 = scmp.lt.s32.totalorder %s1922_s6, 33 }
  0x22   : > { %s3328_s13 = scalar_select %p2039_p12, 1, 0 }
  0x23   : > { %s160_s14 = ssub.s32 %s1914_s29, %s3421_s10  ;;  %s3425_s11 = smov (%p45_p0, %s3423_s11), 0 }
  0x24   : > { %3329 = sst [smem:[#allocation16_spill]] %s3328_s13  ;;  %p245_p2 = pnand %p1635_p13, %p244_p1 }
  0x25   : > { %3330 = sst [smem:[#allocation17_spill]] %s3425_s11  ;;  %s159_s15 = ssub.s32 %s1918_s30, %s3425_s11 }
  0x26   : > { %s161_s16 = sor.u32 %s160_s14, %s159_s15  ;;  %s164_s17 = sadd.s32 1, %s1894_s0 }
  0x27   : > { %p162_p3 = scmp.eq.s32.totalorder %s161_s16, 0  ;;  %248 = sbr.rel (%p245_p2) target bundleno = 604 (0x25c), region = 36 }
  0x28   : > { %p296_p4 = scmp.lt.s32.totalorder (!%p245_p2), %s1906_s27, 1  ;;  %p298_p5 = scmp.lt.s32.totalorder (!%p245_p2), %s1902_s26, 3 }
  0x29   : > { %s2053_s18 = scalar_select %p162_p3, %s1894_s0, %s164_s17  }
  0x2a   : > { %s1641_s7 = sshll.u32 (!%p245_p2), %s1898_s25, 4  ;;  %s3332_s16 = sand.u32 (!%p245_p2), 1, %s1890_s24  }
  0x2b   : > { %3331 = sst [smem:[#allocation18_spill]] %s2053_s18  ;;  %p322_p6 = scmp.lt.s32.totalorder (!%p245_p2), %s1641_s7, 63 }
  0x2c   : > { %s2086_s17 = scalar_lea.vmem (!%p245_p2), [#allocation6], %s3332_s16  ;;  %p1644_p7 = scmp.ne.s32.totalorder (!%p245_p2), %s1898_s25, 0 }
  0x2e   : > { %s297_s20 = scalar_select %p296_p4, %s1906_s27, 1 }
  0x2f   : > { %s299_s21 = scalar_select %p298_p5, %s1902_s26, 3 }
  0x30   : > { %s1636_s22 = sshll.u32 %s297_s20, 2  ;;  %s3427_s7 = smov (!%p322_p6, %s1641_s7), 63  ;;  %v1925_v0 = vmov (!%p1644_p7), -inf   ;;  %v1926_v1 = vmov (!%p1644_p7), inf  }
  0x31   : > { %s2061_s8 = sadd.s32 %s1636_s22, %s299_s21  ;;  %s1642_s22 = sshll.u32 %s297_s20, 6  ;;  %333 = vst [vmem:[#allocation2] sm:$0x1] (!%p1644_p7), %v1925_v0  ;;  %334 = vst [vmem:[#allocation3] sm:$0x1] (!%p1644_p7), %v1926_v1 }
  0x32   : > { %s1637_s14 = sshll.u32 %s2061_s8, 2  ;;  %s1640_s9 = sshll.u32 %s2061_s8, 3 }
  0x33   : > { %s2071_s10 = scalar_lea.vmem %s3300_s1, %s1637_s14  ;;  %s2077_s21 = scalar_lea.vmem %s3302_s3, %s1640_s9 }
  0x34   : > { %s325_s28 = sadd.s32 %s1642_s22, %s3427_s7  ;;  %332 = sbr.rel (%p1644_p7) target bundleno = 59 (0x3b), region = 40 }
  0x35   : > { %s1643_s18 = sshll.u32 %s325_s28, 3 }
  0x36   : > { %s2082_s15 = scalar_lea.vmem %s3303_s4, %s1643_s18 }
  0x3b PF: > { %v2090_v2 = vld [vmem:[%s2082_s15 + $0x10] sm:$0xff]  ;;  %v2093_v3 = vld [vmem:[%s2082_s15] sm:$0xff]  ;;  %s1927_s0 = smov 2   ;;  %v2100_v4 = vld [vmem:[%s2082_s15 + $0x18] sm:$0xff]  ;;  %v1928_v6 = vmov 2   ;;  %v1929_v7 = vmov 0   ;;  %s3333_s11 = scalar_lea.vmem %s3301_s2, %s2061_s8 }
  0x3c   : > { %381 = vrot.lane.b32.xlu1 %v2090_v2, %s1927_s0  ;;  %377 = vrot.lane.b32.xlu0 %v2093_v3, %s1927_s0  ;;  %v2103_v5 = vld [vmem:[%s2082_s15 + $0x8] sm:$0xff]  ;;  %v2114_v9 = vld [vmem:[%s2082_s15 + $0x20] sm:$0xff]  ;;  %s1930_s28 = smov 127   ;;  %v1931_v52 = vmov 3   ;;  %v1932_v59 = vmov 1   ;;  %s1647_s29 = sshll.u32 %s1906_s27, 2 }
  0x3d   : > { %1753 = vset.pattern.permute.xlu1 %v1928_v6  ;;  %1755 = vset.pattern.permute.xlu0 %v1929_v7  ;;  %v2111_v8 = vld [vmem:[%s2082_s15 + $0x28] sm:$0xff]  ;;  %v2121_v10 = vld [vmem:[%s2082_s15 + $0x38] sm:$0xff]  ;;  %v2124_v11 = vld [vmem:[%s2082_s15 + $0x30] sm:$0xff]  ;;  %s2469_s30 = sadd.s32 %s1902_s26, %s1647_s29  ;;  %s1645_s13 = sshll.u32 %s1898_s25, 7 }
  0x3e   : > { %v2131_v12 = vld [vmem:[%s2082_s15 + $0x48] sm:$0xff]  ;;  %v2134_v13 = vld [vmem:[%s2082_s15 + $0x40] sm:$0xff]  ;;  %v2141_v14 = vld [vmem:[%s2082_s15 + $0x58] sm:$0xff]  ;;  %s2474_s9 = sld [smem:[#allocation5 + %s2469_s30]]  ;;  %s1646_s18 = sshll.u32 %s1902_s26, 7 }
  0x3f   : > { %v2144_v15 = vld [vmem:[%s2082_s15 + $0x50] sm:$0xff]  ;;  %v2151_v16 = vld [vmem:[%s2082_s15 + $0x68] sm:$0xff]  ;;  %v2154_v17 = vld [vmem:[%s2082_s15 + $0x60] sm:$0xff] }
  0x40   : > { %383 = vrot.lane.b32.xlu1 %v2100_v4, %s1927_s0  ;;  %379 = vrot.lane.b32.xlu0 %v2103_v5, %s1927_s0  ;;  %v2161_v18 = vld [vmem:[%s2082_s15 + $0x78] sm:$0xff]  ;;  %v2164_v19 = vld [vmem:[%s2082_s15 + $0x70] sm:$0xff] }
  0x44   : > { %387 = vrot.lane.b32.xlu1 %v2111_v8, %s1927_s0  ;;  %385 = vrot.lane.b32.xlu0 %v2114_v9, %s1927_s0  ;;  %p1648_p8 = scmp.eq.s32.totalorder %s2474_s9, 0 }
  0x48   : > { %391 = vrot.lane.b32.xlu1 %v2121_v10, %s1927_s0  ;;  %389 = vrot.lane.b32.xlu0 %v2124_v11, %s1927_s0 }
  0x4c   : > { %395 = vrot.lane.b32.xlu1 %v2131_v12, %s1927_s0  ;;  %393 = vrot.lane.b32.xlu0 %v2134_v13, %s1927_s0 }
  0x50   : > { %399 = vrot.lane.b32.xlu1 %v2141_v14, %s1927_s0  ;;  %397 = vrot.lane.b32.xlu0 %v2144_v15, %s1927_s0 }
  0x54   : > { %403 = vrot.lane.b32.xlu1 %v2151_v16, %s1927_s0  ;;  %401 = vrot.lane.b32.xlu0 %v2154_v17, %s1927_s0 }
  0x58   : > { %407 = vrot.lane.b32.xlu1 %v2161_v18, %s1927_s0  ;;  %405 = vrot.lane.b32.xlu0 %v2164_v19, %s1927_s0 }
  0x5c   : > { %526 = vperm.xlu1 %1753, %v2103_v5   ;;  %610 = vperm.xlu0 %1755, %v2103_v5  }
  0x60   : > { %530 = vperm.xlu1 %1753, %v2090_v2   ;;  %622 = vperm.xlu0 %1755, %v2114_v9  }
  0x64   : > { %538 = vperm.xlu1 %1753, %v2114_v9   ;;  %630 = vperm.xlu0 %1755, %v2124_v11  }
  0x68   : > { %546 = vperm.xlu1 %1753, %v2124_v11   ;;  %638 = vperm.xlu0 %1755, %v2134_v13  }
  0x6c   : > { %554 = vperm.xlu1 %1753, %v2134_v13   ;;  %646 = vperm.xlu0 %1755, %v2144_v15  }
  0x70   : > { %562 = vperm.xlu1 %1753, %v2144_v15  }
  0x74   : > { %570 = vperm.xlu1 %1753, %v2154_v17  }
  0x78   : > { %578 = vperm.xlu1 %1753, %v2164_v19  }
  0x7c   : > { %1754 = vset.pattern.permute.xlu1 %v1929_v7 }
  0x7d   : > { %606 = vperm.xlu1 %1754, %v2093_v3  }
  0x81   : > { %614 = vperm.xlu1 %1754, %v2090_v2  }
  0x85   : > { %618 = vperm.xlu1 %1754, %v2100_v4  }
  0x89   : > { %626 = vperm.xlu1 %1754, %v2111_v8  }
  0x8d   : > { %634 = vperm.xlu1 %1754, %v2121_v10  }
  0x91   : > { %642 = vperm.xlu1 %1754, %v2131_v12  }
  0xae   : > { %v378_v20 = vpop.permute.xlu0 %377  ;;  %v382_v21 = vpop.permute.xlu1 %381 }
  0xaf   : > { %v2190_v22 = vsub.f32 %v2093_v3, %v378_v20  ;;  %v2195_v23 = vsub.f32 %v2090_v2, %v382_v21 }
  0xb1   : > { %457 = vrot.lane.b32.xlu0 %v2190_v22, %s1930_s28 }
  0xb2   : > { %v380_v24 = vpop.permute.xlu0 %379  ;;  %v384_v25 = vpop.permute.xlu1 %383 }
  0xb3   : > { %v2198_v26 = vsub.f32 %v2103_v5, %v380_v24  ;;  %v2205_v27 = vsub.f32 %v2100_v4, %v384_v25 }
  0xb5   : > { %461 = vrot.lane.b32.xlu0 %v2195_v23, %s1930_s28  ;;  %459 = vrot.lane.b32.xlu1 %v2198_v26, %s1930_s28 }
  0xb6   : > { %v386_v28 = vpop.permute.xlu0 %385  ;;  %v388_v29 = vpop.permute.xlu1 %387 }
  0xb7   : > { %v2208_v30 = vsub.f32 %v2114_v9, %v386_v28  ;;  %v2215_v31 = vsub.f32 %v2111_v8, %v388_v29 }
  0xb9   : > { %463 = vrot.lane.b32.xlu1 %v2205_v27, %s1930_s28  ;;  %465 = vrot.lane.b32.xlu0 %v2208_v30, %s1930_s28 }
  0xba   : > { %v390_v32 = vpop.permute.xlu0 %389  ;;  %v392_v33 = vpop.permute.xlu1 %391 }
  0xbb   : > { %v2218_v34 = vsub.f32 %v2124_v11, %v390_v32  ;;  %v2225_v35 = vsub.f32 %v2121_v10, %v392_v33  ;;  %v1933_v33 = vmov 4  }
  0xbd   : > { %467 = vrot.lane.b32.xlu1 %v2215_v31, %s1930_s28  ;;  %469 = vrot.lane.b32.xlu0 %v2218_v34, %s1930_s28 }
  0xbe   : > { %v394_v36 = vpop.permute.xlu0 %393  ;;  %v396_v37 = vpop.permute.xlu1 %395 }
  0xbf   : > { %v2228_v38 = vsub.f32 %v2134_v13, %v394_v36  ;;  %v2235_v39 = vsub.f32 %v2131_v12, %v396_v37 }
  0xc1   : > { %471 = vrot.lane.b32.xlu1 %v2225_v35, %s1930_s28  ;;  %473 = vrot.lane.b32.xlu0 %v2228_v38, %s1930_s28 }
  0xc2   : > { %v398_v40 = vpop.permute.xlu0 %397  ;;  %v400_v41 = vpop.permute.xlu1 %399 }
  0xc3   : > { %v2238_v42 = vsub.f32 %v2144_v15, %v398_v40  ;;  %v2245_v43 = vsub.f32 %v2141_v14, %v400_v41 }
  0xc5   : > { %475 = vrot.lane.b32.xlu1 %v2235_v39, %s1930_s28  ;;  %477 = vrot.lane.b32.xlu0 %v2238_v42, %s1930_s28 }
  0xc6   : > { %v402_v44 = vpop.permute.xlu0 %401  ;;  %v404_v45 = vpop.permute.xlu1 %403 }
  0xc7   : > { %v2248_v46 = vsub.f32 %v2154_v17, %v402_v44  ;;  %v2255_v47 = vsub.f32 %v2151_v16, %v404_v45 }
  0xc9   : > { %479 = vrot.lane.b32.xlu1 %v2245_v43, %s1930_s28  ;;  %481 = vrot.lane.b32.xlu0 %v2248_v46, %s1930_s28 }
  0xca   : > { %v406_v48 = vpop.permute.xlu0 %405  ;;  %v408_v49 = vpop.permute.xlu1 %407 }
  0xcb   : > { %v2258_v50 = vsub.f32 %v2164_v19, %v406_v48  ;;  %v2265_v51 = vsub.f32 %v2161_v18, %v408_v49 }
  0xcd   : > { %483 = vrot.lane.b32.xlu1 %v2255_v47, %s1930_s28  ;;  %485 = vrot.lane.b32.xlu0 %v2258_v50, %s1930_s28 }
  0xd1   : > { %487 = vrot.lane.b32.xlu1 %v2265_v51, %s1930_s28  ;;  %654 = vperm.xlu0 %1755, %v2154_v17  }
  0xd5   : > { %650 = vperm.xlu1 %1754, %v2141_v14   ;;  %662 = vperm.xlu0 %1755, %v2164_v19  }
  0xd9   : > { %658 = vperm.xlu1 %1754, %v2151_v16   ;;  %1756 = vset.pattern.permute.xlu0 %v1931_v52 }
  0xda   : > { %722 = vperm.xlu0 %1756, %v2093_v3  }
  0xdb   : > { %v2274_v53 = vpop.permute.xlu1 %526  ;;  %v2310_v62 = vpop.permute.xlu0 %610 }
  0xdd   : > { %666 = vperm.xlu1 %1754, %v2161_v18  }
  0xde   : > { %734 = vperm.xlu0 %1756, %v2100_v4  }
  0xdf   : > { %v2278_v54 = vpop.permute.xlu1 %530  ;;  %v2318_v0 = vpop.permute.xlu0 %622 }
  0xe1   : > { %1757 = vset.pattern.permute.xlu1 %v1931_v52 }
  0xe2   : > { %726 = vperm.xlu1 %1757, %v2103_v5   ;;  %742 = vperm.xlu0 %1756, %v2111_v8  }
  0xe3   : > { %v2282_v55 = vpop.permute.xlu1 %538  ;;  %v2326_v20 = vpop.permute.xlu0 %630 }
  0xe6   : > { %730 = vperm.xlu1 %1757, %v2090_v2   ;;  %750 = vperm.xlu0 %1756, %v2121_v10  }
  0xe7   : > { %v2286_v56 = vpop.permute.xlu1 %546  ;;  %v2335_v24 = vpop.permute.xlu0 %638 }
  0xea   : > { %738 = vperm.xlu1 %1757, %v2114_v9   ;;  %758 = vperm.xlu0 %1756, %v2131_v12  }
  0xeb   : > { %v2292_v57 = vpop.permute.xlu1 %554  ;;  %v2341_v28 = vpop.permute.xlu0 %646 }
  0xee   : > { %746 = vperm.xlu1 %1757, %v2124_v11   ;;  %766 = vperm.xlu0 %1756, %v2141_v14  }
  0xef   : > { %v2296_v58 = vpop.permute.xlu1 %562 }
  0xf2   : > { %754 = vperm.xlu1 %1757, %v2134_v13   ;;  %774 = vperm.xlu0 %1756, %v2151_v16  }
  0xf3   : > { %v2301_v60 = vpop.permute.xlu1 %570 }
  0xf6   : > { %762 = vperm.xlu1 %1757, %v2144_v15   ;;  %782 = vperm.xlu0 %1756, %v2161_v18  }
  0xf7   : > { %v2306_v61 = vpop.permute.xlu1 %578 }
  0xfa   : > { %770 = vperm.xlu1 %1757, %v2154_v17   ;;  %1759 = vset.pattern.permute.xlu0 %v1932_v59 }
  0xfb   : > { %810 = vperm.xlu0 %1759, %v2103_v5  }
  0xfc   : > { %v2312_v63 = vpop.permute.xlu1 %606 }
  0xfe   : > { %778 = vperm.xlu1 %1757, %v2164_v19  }
  0xff   : > { %822 = vperm.xlu0 %1759, %v2114_v9  }
 0x100   : > { %v2320_v1 = vpop.permute.xlu1 %614 }
 0x102   : > { %1758 = vset.pattern.permute.xlu1 %v1932_v59 }
 0x103   : > { %806 = vperm.xlu1 %1758, %v2093_v3   ;;  %830 = vperm.xlu0 %1759, %v2124_v11  }
 0x104   : > { %v2324_v7 = vpop.permute.xlu1 %618 }
 0x107   : > { %814 = vperm.xlu1 %1758, %v2090_v2   ;;  %838 = vperm.xlu0 %1759, %v2134_v13  }
 0x108   : > { %v2330_v21 = vpop.permute.xlu1 %626 }
 0x10b   : > { %818 = vperm.xlu1 %1758, %v2100_v4   ;;  %846 = vperm.xlu0 %1759, %v2144_v15  }
 0x10c   : > { %v2339_v25 = vpop.permute.xlu1 %634 }
 0x10f   : > { %826 = vperm.xlu1 %1758, %v2111_v8   ;;  %854 = vperm.xlu0 %1759, %v2154_v17  }
 0x110   : > { %v2345_v29 = vpop.permute.xlu1 %642 }
 0x113   : > { %834 = vperm.xlu1 %1758, %v2121_v10   ;;  %862 = vperm.xlu0 %1759, %v2164_v19  }
 0x117   : > { %842 = vperm.xlu1 %1758, %v2131_v12   ;;  %1760 = vset.pattern.permute.xlu0 %v1928_v6 }
 0x118   : > { %522 = vperm.xlu0 %1760, %v2093_v3  }
 0x11b   : > { %850 = vperm.xlu1 %1758, %v2141_v14  }
 0x11c   : > { %534 = vperm.xlu0 %1760, %v2100_v4  }
 0x11f   : > { %858 = vperm.xlu1 %1758, %v2151_v16  }
 0x120   : > { %542 = vperm.xlu0 %1760, %v2111_v8  }
 0x123   : > { %866 = vperm.xlu1 %1758, %v2161_v18   ;;  %v458_v32 = vpop.permute.xlu0 %457 }
 0x124   : > { %550 = vperm.xlu0 %1760, %v2121_v10  }
 0x127   : > { %1761 = vset.pattern.permute.xlu1 %v1933_v33  ;;  %v460_v36 = vpop.permute.xlu1 %459  ;;  %v462_v37 = vpop.permute.xlu0 %461 }
 0x128   : > { %1142 = vperm.xlu1 %1761, %v2093_v3   ;;  %558 = vperm.xlu0 %1760, %v2131_v12   ;;  %v506_v40 = vmul.f32 %v460_v36, %v2198_v26  ;;  %v507_v45 = vmul.f32 %v462_v37, %v2195_v23  ;;  %v505_v26 = vmul.f32 %v458_v32, %v2190_v22 }
 0x12b   : > { %v464_v41 = vpop.permute.xlu1 %463  ;;  %v466_v44 = vpop.permute.xlu0 %465 }
 0x12c   : > { %1762 = vset.pattern.permute.xlu1 %v1928_v6  ;;  %566 = vperm.xlu0 %1760, %v2141_v14   ;;  %v509_v3 = vmul.f32 %v466_v44, %v2208_v30  ;;  %v508_v23 = vmul.f32 %v464_v41, %v2205_v27 }
 0x12d   : > { %944 = vperm.xlu1 %1762, %v506_v40  }
 0x12f   : > { %v470_v48 = vpop.permute.xlu0 %469  ;;  %v468_v49 = vpop.permute.xlu1 %467 }
 0x130   : > { %574 = vperm.xlu0 %1760, %v2151_v16   ;;  %v511_v6 = vmul.f32 %v470_v48, %v2218_v34  ;;  %v510_v30 = vmul.f32 %v468_v49, %v2215_v31 }
 0x131   : > { %949 = vperm.xlu1 %1762, %v507_v45  }
 0x133   : > { %v474_v52 = vpop.permute.xlu0 %473  ;;  %v472_v59 = vpop.permute.xlu1 %471 }
 0x134   : > { %582 = vperm.xlu0 %1760, %v2161_v18   ;;  %v513_v37 = vmul.f32 %v474_v52, %v2228_v38  ;;  %v512_v22 = vmul.f32 %v472_v59, %v2225_v35 }
 0x135   : > { %959 = vperm.xlu1 %1762, %v509_v3  }
 0x137   : > { %v478_v36 = vpop.permute.xlu0 %477  ;;  %v476_v40 = vpop.permute.xlu1 %475 }
 0x138   : > { %939 = vperm.xlu0 %1760, %v505_v26   ;;  %v515_v45 = vmul.f32 %v478_v36, %v2238_v42  ;;  %v514_v27 = vmul.f32 %v476_v40, %v2235_v39 }
 0x139   : > { %969 = vperm.xlu1 %1762, %v511_v6   ;;  %v2416_v6 = vld [vmem:[%s2071_s10] sm:$0xf] }
 0x13b   : > { %v482_v44 = vpop.permute.xlu0 %481  ;;  %v480_v34 = vpop.permute.xlu1 %479 }
 0x13c   : > { %954 = vperm.xlu0 %1760, %v508_v23   ;;  %v517_v32 = vmul.f32 %v482_v44, %v2248_v46  ;;  %v516_v31 = vmul.f32 %v480_v34, %v2245_v43 }
 0x13d   : > { %979 = vperm.xlu1 %1762, %v513_v37  }
 0x13f   : > { %v486_v48 = vpop.permute.xlu0 %485  ;;  %v484_v41 = vpop.permute.xlu1 %483 }
 0x140   : > { %964 = vperm.xlu0 %1760, %v510_v30   ;;  %v519_v38 = vmul.f32 %v486_v48, %v2258_v50  ;;  %v518_v42 = vmul.f32 %v484_v41, %v2255_v47 }
 0x141   : > { %989 = vperm.xlu1 %1762, %v515_v45  }
 0x143   : > { %v488_v35 = vpop.permute.xlu1 %487 }
 0x144   : > { %974 = vperm.xlu0 %1760, %v512_v22   ;;  %v520_v49 = vmul.f32 %v488_v35, %v2265_v51 }
 0x145   : > { %999 = vperm.xlu1 %1762, %v517_v32  }
 0x148   : > { %984 = vperm.xlu0 %1760, %v514_v27  }
 0x149   : > { %1009 = vperm.xlu1 %1762, %v519_v38  }
 0x14c   : > { %994 = vperm.xlu0 %1760, %v516_v31  }
 0x14d   : > { %1764 = vset.pattern.permute.xlu1 %v1933_v33 }
 0x14e   : > { %1150 = vperm.xlu1 %1764, %v2090_v2  }
 0x150   : > { %1004 = vperm.xlu0 %1760, %v518_v42   ;;  %v2371_v46 = vpop.permute.xlu0 %654 }
 0x152   : > { %1154 = vperm.xlu1 %1764, %v2100_v4  }
 0x154   : > { %v2375_v39 = vpop.permute.xlu1 %650  ;;  %1014 = vperm.xlu0 %1760, %v520_v49   ;;  %v2377_v50 = vpop.permute.xlu0 %662 }
 0x156   : > { %1162 = vperm.xlu1 %1764, %v2111_v8  }
 0x158   : > { %v2380_v43 = vpop.permute.xlu1 %658  ;;  %1763 = vset.pattern.permute.xlu0 %v1933_v33 }
 0x159   : > { %1146 = vperm.xlu0 %1763, %v2103_v5   ;;  %v723_v2 = vpop.permute.xlu0 %722 }
 0x15a   : > { %1170 = vperm.xlu1 %1764, %v2121_v10  }
 0x15c   : > { %v2384_v47 = vpop.permute.xlu1 %666 }
 0x15d   : > { %1158 = vperm.xlu0 %1763, %v2114_v9   ;;  %v2387_v4 = vpop.permute.xlu0 %734 }
 0x15e   : > { %1178 = vperm.xlu1 %1764, %v2131_v12  }
 0x161   : > { %v727_v51 = vpop.permute.xlu1 %726  ;;  %1166 = vperm.xlu0 %1763, %v2124_v11   ;;  %v2391_v8 = vpop.permute.xlu0 %742  ;;  %v585_v11 = vlaneseq }
 0x162   : > { %1186 = vperm.xlu1 %1764, %v2141_v14  }
 0x165   : > { %v731_v33 = vpop.permute.xlu1 %730  ;;  %1174 = vperm.xlu0 %1763, %v2134_v13   ;;  %v2395_v5 = vpop.permute.xlu0 %750  ;;  %v2406_v13 = vshrl.u32 %v585_v11, 7 }
 0x166   : > { %1194 = vperm.xlu1 %1764, %v2151_v16  }
 0x167   : > { %v787_v52 = vsub.s32 3, %v2406_v13  ;;  %v587_v44 = vsub.s32 2, %v2406_v13  ;;  %v2432_v45 = vsub.s32 0, %v2406_v13 }
 0x169   : > { %v739_v10 = vpop.permute.xlu1 %738  ;;  %1182 = vperm.xlu0 %1763, %v2144_v15   ;;  %v2399_v9 = vpop.permute.xlu0 %758  ;;  %v871_v15 = vsub.s32 1, %v2406_v13  ;;  %v2422_v59 = vrot.slane %v2416_v6, %v787_v52  ;;  %v2441_v27 = vrot.slane %v2416_v6, %v587_v44  ;;  %v2445_v38 = vrot.slane %v2416_v6, %v2432_v45 }
 0x16a   : > { %1202 = vperm.xlu1 %1764, %v2161_v18  }
 0x16b   : > { %v793_v34 = vmin.f32 %v739_v10, %v2422_v59  ;;  %v789_v42 = vmin.f32 %v723_v2, %v2422_v59  ;;  %v599_v52 = vmin.f32 %v2296_v58, %v2441_v27  ;;  %v791_v2 = vmin.f32 %v731_v33, %v2422_v59 }
 0x16d   : > { %v747_v12 = vpop.permute.xlu1 %746  ;;  %1190 = vperm.xlu0 %1763, %v2154_v17   ;;  %v2403_v14 = vpop.permute.xlu0 %766  ;;  %v2419_v17 = vrot.slane %v2416_v6, %v871_v15 }
 0x16e   : > { %v795_v35 = vmin.f32 %v747_v12, %v2422_v59 }
 0x171   : > { %v755_v3 = vpop.permute.xlu1 %754  ;;  %1198 = vperm.xlu0 %1763, %v2164_v19   ;;  %v2409_v16 = vpop.permute.xlu0 %774  ;;  %v790_v19 = vmin.f32 %v727_v51, %v2422_v59 }
 0x172   : > { %v797_v12 = vmin.f32 %v755_v3, %v2422_v59  ;;  %v792_v3 = vmin.f32 %v2387_v4, %v2422_v59 }
 0x175   : > { %v763_v26 = vpop.permute.xlu1 %762  ;;  %v2413_v18 = vpop.permute.xlu0 %782 }
 0x179   : > { %v771_v36 = vpop.permute.xlu1 %770 }
 0x17a   : > { %v811_v23 = vpop.permute.xlu0 %810 }
 0x17b   : > { %v874_v37 = vmax.f32 %v811_v23, %v2419_v17  ;;  %v683_v23 = vmax.f32 %v2341_v28, %v2445_v38  ;;  %v685_v28 = vmax.f32 %v2371_v46, %v2445_v38 }
 0x17d   : > { %v2426_v40 = vsub.f32 %v790_v19, %v874_v37  ;;  %v2428_v30 = vpop.permute.xlu1 %778  ;;  %v699_v58 = vsub.f32 %v599_v52, %v683_v23 }
 0x17e   : > { %v823_v22 = vpop.permute.xlu0 %822 }
 0x17f   : > { %v877_v32 = vmax.f32 %v823_v22, %v2419_v17 }
 0x181   : > { %v2436_v48 = vsub.f32 %v793_v34, %v877_v32 }
 0x182   : > { %v807_v41 = vpop.permute.xlu1 %806  ;;  %v831_v31 = vpop.permute.xlu0 %830 }
 0x183   : > { %v873_v49 = vmax.f32 %v807_v41, %v2419_v17  ;;  %v879_v51 = vmax.f32 %v831_v31, %v2419_v17 }
 0x185   : > { %v2451_v10 = vsub.f32 %v789_v42, %v873_v49  ;;  %v2453_v15 = vsub.f32 %v795_v35, %v879_v51  ;;  %v799_v42 = vmin.f32 %v763_v26, %v2422_v59  ;;  %v601_v51 = vmin.f32 %v2301_v60, %v2441_v27 }
 0x186   : > { %v815_v19 = vpop.permute.xlu1 %814  ;;  %v839_v37 = vpop.permute.xlu0 %838  ;;  %v801_v26 = vmin.f32 %v771_v36, %v2422_v59  ;;  %v603_v60 = vmin.f32 %v2306_v61, %v2441_v27 }
 0x187   : > { %v875_v22 = vmax.f32 %v815_v19, %v2419_v17  ;;  %v881_v34 = vmax.f32 %v839_v37, %v2419_v17  ;;  %v715_v19 = vmax.f32 %v699_v58, 0.0  ;;  %v701_v46 = vsub.f32 %v601_v51, %v685_v28 }
 0x188   : > { %v687_v37 = vmax.f32 %v2377_v50, %v2445_v38 }
 0x189   : > { %v2464_v32 = vsub.f32 %v791_v2, %v875_v22  ;;  %v2466_v41 = vsub.f32 %v797_v12, %v881_v34  ;;  %v794_v2 = vmin.f32 %v2391_v8, %v2422_v59  ;;  %v717_v50 = vmax.f32 %v701_v46, 0.0 }
 0x18a   : > { %v819_v31 = vpop.permute.xlu1 %818  ;;  %v847_v33 = vpop.permute.xlu0 %846  ;;  %v703_v8 = vsub.f32 %v603_v60, %v687_v37 }
 0x18b   : > { %v876_v35 = vmax.f32 %v819_v31, %v2419_v17  ;;  %v883_v49 = vmax.f32 %v847_v33, %v2419_v17 }
 0x18d   : > { %v892_v52 = vsub.f32 %v792_v3, %v876_v35  ;;  %v899_v23 = vsub.f32 %v799_v42, %v883_v49  ;;  %v803_v35 = vmin.f32 %v2428_v30, %v2422_v59 }
 0x18e   : > { %v827_v4 = vpop.permute.xlu1 %826  ;;  %v855_v12 = vpop.permute.xlu0 %854 }
 0x18f   : > { %v915_v22 = vmax.f32 %v899_v23, 0.0  ;;  %v878_v34 = vmax.f32 %v827_v4, %v2419_v17  ;;  %v885_v31 = vmax.f32 %v855_v12, %v2419_v17  ;;  %v719_v12 = vmax.f32 %v703_v8, 0.0 }
 0x191   : > { %v894_v58 = vsub.f32 %v794_v2, %v878_v34  ;;  %v901_v28 = vsub.f32 %v801_v26, %v885_v31  ;;  %v2492_v33 = vmul.f32 %v915_v22, %v715_v19  ;;  %v673_v19 = vmax.f32 %v2312_v63, %v2445_v38 }
 0x192   : > { %v835_v3 = vpop.permute.xlu1 %834  ;;  %v863_v42 = vpop.permute.xlu0 %862  ;;  %v676_v34 = vmax.f32 %v2324_v7, %v2445_v38  ;;  %v905_v31 = vmax.f32 %v2451_v10, 0.0  ;;  %v678_v63 = vmax.f32 %v2330_v21, %v2445_v38  ;;  %v796_v7 = vmin.f32 %v2395_v5, %v2422_v59 }
 0x193   : > { %v917_v36 = vmax.f32 %v901_v28, 0.0  ;;  %v887_v49 = vmax.f32 %v863_v42, %v2419_v17 }
 0x195   : > { %v903_v51 = vsub.f32 %v803_v35, %v887_v49  ;;  %v2497_v23 = vmul.f32 %v917_v36, %v717_v50  ;;  %v908_v36 = vmax.f32 %v892_v52, 0.0  ;;  %v880_v49 = vmax.f32 %v835_v3, %v2419_v17 }
 0x196   : > { %v843_v4 = vpop.permute.xlu1 %842 }
 0x197   : > { %v919_v61 = vmax.f32 %v903_v51, 0.0  ;;  %v523_v2 = vpop.permute.xlu0 %522  ;;  %v896_v21 = vsub.f32 %v796_v7, %v880_v49  ;;  %v882_v52 = vmax.f32 %v843_v4, %v2419_v17 }
 0x198   : > { %v589_v46 = vmin.f32 %v523_v2, %v2441_v27  ;;  %v680_v2 = vmax.f32 %v2339_v25, %v2445_v38 }
 0x199   : > { %v2502_v26 = vmul.f32 %v919_v61, %v719_v12 }
 0x19a   : > { %v689_v37 = vsub.f32 %v589_v46, %v673_v19  ;;  %v851_v22 = vpop.permute.xlu1 %850  ;;  %v910_v19 = vmax.f32 %v894_v58, 0.0 }
 0x19b   : > { %v535_v30 = vpop.permute.xlu0 %534  ;;  %v884_v25 = vmax.f32 %v851_v22, %v2419_v17 }
 0x19c   : > { %v705_v60 = vmax.f32 %v689_v37, 0.0  ;;  %v592_v28 = vmin.f32 %v535_v30, %v2441_v27 }
 0x19e   : > { %v692_v50 = vsub.f32 %v592_v28, %v676_v34  ;;  %v859_v42 = vpop.permute.xlu1 %858  ;;  %v2508_v8 = vmul.f32 %v905_v31, %v705_v60  ;;  %v798_v34 = vmin.f32 %v2399_v9, %v2422_v59  ;;  %v682_v60 = vmax.f32 %v2345_v29, %v2445_v38 }
 0x19f   : > { %v543_v35 = vpop.permute.xlu0 %542  ;;  %v886_v7 = vmax.f32 %v859_v42, %v2419_v17 }
 0x1a0   : > { %v708_v51 = vmax.f32 %v692_v50, 0.0  ;;  %v594_v12 = vmin.f32 %v543_v35, %v2441_v27  ;;  %v912_v50 = vmax.f32 %v896_v21, 0.0 }
 0x1a2   : > { %v694_v10 = vsub.f32 %v594_v12, %v678_v63  ;;  %v2516_v61 = vmul.f32 %v908_v36, %v708_v51  ;;  %v867_v46 = vpop.permute.xlu1 %866  ;;  %v898_v63 = vsub.f32 %v798_v34, %v882_v52  ;;  %v800_v36 = vmin.f32 %v2403_v14, %v2422_v59 }
 0x1a3   : > { %v551_v37 = vpop.permute.xlu0 %550  ;;  %v684_v51 = vmax.f32 %v2375_v39, %v2445_v38  ;;  %v337_v14 = vrot.slane %v2416_v6, 6  ;;  %v686_v39 = vmax.f32 %v2380_v43, %v2445_v38  ;;  %v888_v42 = vmax.f32 %v867_v46, %v2419_v17 }
 0x1a4   : > { %v710_v30 = vmax.f32 %v694_v10, 0.0  ;;  %v596_v3 = vmin.f32 %v551_v37, %v2441_v27  ;;  %v900_v29 = vsub.f32 %v800_v36, %v884_v25  ;;  %v914_v22 = vmax.f32 %v898_v63, 0.0 }
 0x1a5   : > { %v802_v37 = vmin.f32 %v2409_v16, %v2422_v59  ;;  %v804_v16 = vmin.f32 %v2413_v18, %v2422_v59  ;;  %v688_v43 = vmax.f32 %v2384_v47, %v2445_v38  ;;  %v590_v47 = vmin.f32 %v2274_v53, %v2441_v27  ;;  %v2580_v53 = vld [vmem:[%s3333_s11] sm:$0x1] }
 0x1a6   : > { %v696_v31 = vsub.f32 %v596_v3, %v680_v2  ;;  %v2524_v5 = vmul.f32 %v910_v19, %v710_v30  ;;  %v916_v30 = vmax.f32 %v900_v29, 0.0 }
 0x1a7   : > { %v559_v58 = vpop.permute.xlu0 %558  ;;  %v2529_v28 = vpop.permute.xlu1 %1142  ;;  %v902_v34 = vsub.f32 %v802_v37, %v886_v7  ;;  %v904_v36 = vsub.f32 %v804_v16, %v888_v42  ;;  %v674_v7 = vmax.f32 %v2310_v62, %v2445_v38  ;;  %v593_v37 = vmin.f32 %v2282_v55, %v2441_v27 }
 0x1a8   : > { %v712_v4 = vmax.f32 %v696_v31, 0.0  ;;  %v598_v35 = vmin.f32 %v559_v58, %v2441_v27  ;;  %v339_v58 = vsub.f32 %v2416_v6, %v337_v14  ;;  %v681_v42 = vmax.f32 %v2335_v24, %v2445_v38 }
 0x1a9   : > { %v920_v6 = vmax.f32 %v904_v36, 0.0  ;;  %v690_v62 = vsub.f32 %v590_v47, %v674_v7  ;;  %v2608_v24 = vstv %s1645_s13 }
 0x1aa   : > { %v698_v9 = vsub.f32 %v598_v35, %v682_v60  ;;  %v2534_v49 = vmul.f32 %v912_v50, %v712_v4  ;;  %v918_v35 = vmax.f32 %v902_v34, 0.0 }
 0x1ab   : > { %v567_v12 = vpop.permute.xlu0 %566 }
 0x1ac   : > { %v714_v10 = vmax.f32 %v698_v9, 0.0  ;;  %v600_v2 = vmin.f32 %v567_v12, %v2441_v27  ;;  %v945_v19 = vpop.permute.xlu1 %944 }
 0x1ae   : > { %v700_v21 = vsub.f32 %v600_v2, %v684_v51  ;;  %v2543_v52 = vmul.f32 %v914_v22, %v714_v10  ;;  %v341_v51 = vrot.slane %v339_v58, 1 }
 0x1af   : > { %v575_v3 = vpop.permute.xlu0 %574 }
 0x1b0   : > { %v716_v31 = vmax.f32 %v700_v21, 0.0  ;;  %v602_v60 = vmin.f32 %v575_v3, %v2441_v27  ;;  %v2549_v25 = vpop.permute.xlu1 %949  ;;  %v343_v10 = vmul.f32 %v341_v51, %v339_v58  ;;  %v677_v21 = vmax.f32 %v2318_v0, %v2445_v38 }
 0x1b1   : > { %v679_v3 = vmax.f32 %v2326_v20, %v2445_v38  ;;  %v597_v0 = vmin.f32 %v2292_v57, %v2441_v27  ;;  %v2600_v20 = vrot.slane %v2580_v53, %v2432_v45  ;;  %v706_v57 = vmax.f32 %v690_v62, 0.0 }
 0x1b2   : > { %v702_v50 = vsub.f32 %v602_v60, %v686_v39  ;;  %v2554_v63 = vmul.f32 %v916_v30, %v716_v31  ;;  %v595_v30 = vmin.f32 %v2286_v56, %v2441_v27  ;;  %v2589_v55 = vrot.slane %v343_v10, %v587_v44 }
 0x1b3   : > { %v583_v4 = vpop.permute.xlu0 %582  ;;  %v693_v34 = vsub.f32 %v593_v37, %v677_v21  ;;  %v591_v56 = vmin.f32 %v2278_v54, %v2441_v27  ;;  %v675_v44 = vmax.f32 %v2320_v1, %v2445_v38  ;;  %v906_v60 = vmax.f32 %v2426_v40, 0.0 }
 0x1b4   : > { %v718_v17 = vmax.f32 %v702_v50, 0.0  ;;  %v604_v46 = vmin.f32 %v583_v4, %v2441_v27  ;;  %v960_v9 = vpop.permute.xlu1 %959  ;;  %v909_v58 = vmax.f32 %v2436_v48, 0.0  ;;  %v1122_v50 = vand.u32 127, %v585_v11 }
 0x1b5   : > { %v1123_v54 = vstv %s1646_s18  ;;  %v1022_v27 = vadd.f32 %v2589_v55, %v945_v19  ;;  %v1090_v4 = vadd.s32 24, %v2406_v13  ;;  %v2613_v36 = vsub.f32 %v597_v0, %v681_v42 }
 0x1b6   : > { %v704_v29 = vsub.f32 %v604_v46, %v688_v43  ;;  %v2559_v12 = vmul.f32 %v918_v35, %v718_v17  ;;  %v695_v43 = vsub.f32 %v595_v30, %v679_v3  ;;  %v709_v35 = vmax.f32 %v693_v34, 0.0 }
 0x1b7   : > { %v940_v18 = vpop.permute.xlu0 %939  ;;  %v1025_v1 = vadd.f32 %v2589_v55, %v960_v9  ;;  %v1089_v38 = vadd.s32 16, %v2406_v13  ;;  %v691_v17 = vsub.f32 %v591_v56, %v675_v44  ;;  %v2619_v48 = vadd.s32 %v2608_v24, %v2406_v13 }
 0x1b8   : > { %v720_v59 = vmax.f32 %v704_v29, 0.0  ;;  %v2561_v22 = vpop.permute.xlu1 %969  ;;  %v2621_v11 = vmul.f32 %v906_v60, %v706_v57  ;;  %v1021_v46 = vadd.f32 %v2589_v55, %v940_v18  ;;  %v2626_v51 = vadd.s32 %v1123_v54, %v1122_v50 }
 0x1b9   : > { %v2628_v29 = vmul.f32 %v909_v58, %v709_v35  ;;  %v2635_v10 = vadd.s32 %v2608_v24, %v1090_v4  ;;  %v713_v18 = vmax.f32 %v2613_v36, 0.0  ;;  %v2641_v30 = vadd.s32 %v2608_v24, %v1089_v38 }
 0x1ba   : > { %v2567_v2 = vmul.f32 %v920_v6, %v720_v59  ;;  %v1092_v6 = vadd.s32 40, %v2406_v13  ;;  %v711_v59 = vmax.f32 %v695_v43, 0.0  ;;  %v1038_v47 = vsub.f32 %v1022_v27, %v2621_v11 }
 0x1bb   : > { %v955_v14 = vpop.permute.xlu0 %954  ;;  %v1041_v37 = vsub.f32 %v1025_v1, %v2628_v29  ;;  %v707_v3 = vmax.f32 %v691_v17, 0.0  ;;  %v907_v0 = vmax.f32 %v2464_v32, 0.0  ;;  %v1037_v34 = vsub.f32 %v1021_v46, %v2508_v8 }
 0x1bc   : > { %v2573_v39 = vpop.permute.xlu1 %979  ;;  %v1024_v7 = vadd.f32 %v2589_v55, %v955_v14  ;;  %v1088_v14 = vadd.s32 8, %v2406_v13  ;;  %vm3313_vm0 = vcmp.lt.s32.totalorder %v2619_v48, %v2626_v51  ;;  %v2652_v56 = vadd.s32 %v2608_v24, %v1092_v6 }
 0x1bd   : > { %v1094_v44 = vadd.s32 56, %v2406_v13  ;;  %1765 = vrcp.f32 %v1038_v47  ;;  %v1023_v32 = vadd.f32 %v2589_v55, %v2549_v25  ;;  %vm3312_vm1 = vcmp.lt.s32.totalorder %v2635_v10, %v2626_v51 }
 0x1be   : > { %v1040_v60 = vsub.f32 %v1024_v7, %v2516_v61  ;;  %v1091_v57 = vadd.s32 32, %v2406_v13  ;;  %v911_v58 = vmax.f32 %v2453_v15, 0.0  ;;  %1767 = vrcp.f32 %v1041_v37 }
 0x1bf   : > { %v965_v31 = vpop.permute.xlu0 %964  ;;  %vm3315_vm2 = vcmp.lt.s32.totalorder %v2641_v30, %v2626_v51  ;;  %v2666_v27 = vmul.f32 %v907_v0, %v707_v3  ;;  %1769 = vrcp.f32 %v1037_v34  ;;  %v2669_v25 = vadd.s32 %v2608_v24, %v1088_v14 }
 0x1c0   : > { %v2605_v16 = vpop.permute.xlu1 %989  ;;  %v1026_v9 = vadd.f32 %v2589_v55, %v965_v31  ;;  %v1096_v4 = vadd.s32 72, %v2406_v13  ;;  %v1027_v15 = vadd.f32 %v2589_v55, %v2561_v22  ;;  %vm3314_vm3 = vcmp.lt.s32.totalorder %v2652_v56, %v2626_v51 }
 0x1c1   : > { %v2679_v36 = vadd.s32 %v2608_v24, %v1094_v44  ;;  %v913_v1 = vmax.f32 %v2466_v41, 0.0  ;;  %v2684_v38 = vadd.s32 %v2608_v24, %v1091_v57  ;;  %v2686_v17 = vmul.f32 %v911_v58, %v711_v59 }
 0x1c2   : > { %v1042_v31 = vsub.f32 %v1026_v9, %v2524_v5  ;;  %vm1126_vm4 = vcmp.lt.s32.totalorder %v2669_v25, %v2626_v51  ;;  %v2693_v6 = vadd.s32 %v2608_v24, %v1096_v4  ;;  %v1093_v41 = vadd.s32 48, %v2406_v13 }
 0x1c3   : > { %v975_v40 = vpop.permute.xlu0 %974  ;;  %v1098_v47 = vadd.s32 88, %v2406_v13  ;;  %vm1227_vm5 = vcmp.eq.f32.partialorder %v2529_v28, %v2600_v20  ;;  %v1043_v59 = vsub.f32 %v1027_v15, %v2686_v17  ;;  %v1029_v7 = vadd.f32 %v2589_v55, %v2573_v39 }
 0x1c4   : > { %v2624_v19 = vpop.permute.xlu1 %999  ;;  %v1028_v21 = vadd.f32 %v2589_v55, %v975_v40  ;;  %1771 = vrcp.f32 %v1042_v31  ;;  %v1039_v40 = vsub.f32 %v1023_v32, %v2666_v27  ;;  %vm3316_vm6 = vcmp.lt.s32.totalorder %v2679_v36, %v2626_v51  ;;  %vm2724_vm11 = vmand %vm3313_vm0, %vm1227_vm5 }
 0x1c5   : > { %1773 = vrcp.f32 %v1040_v60  ;;  %v1031_v3 = vadd.f32 %v2589_v55, %v2605_v16  ;;  %vm1129_vm9 = vcmp.lt.s32.totalorder %v2684_v38, %v2626_v51  ;;  %vm1211_vm10 = vcmp.gt.f32.partialorder %v2529_v28, %v2600_v20 }
 0x1c6   : > { %v1044_v50 = vsub.f32 %v1028_v21, %v2534_v49  ;;  %v1095_v21 = vadd.s32 64, %v2406_v13  ;;  %v2732_v31 = vadd.s32 %v2608_v24, %v1098_v47  ;;  %v1100_v44 = vadd.s32 104, %v2406_v13  ;;  %vm2771_vm0 = vmor %vm1211_vm10, %vm2724_vm11 }
 0x1c7   : > { %v985_v62 = vpop.permute.xlu0 %984  ;;  %v1766_v14 = vpop.eup %1765  ;;  %vm1134_vm14 = vcmp.lt.s32.totalorder %v2693_v6, %v2626_v51  ;;  %v3381_v6 = vmov (!%p1648_p8), 0 }
 0x1c8   : > { %v2645_v42 = vpop.permute.xlu1 %1009  ;;  %v1030_v43 = vadd.f32 %v2589_v55, %v985_v62  ;;  %1775 = vrcp.f32 %v1044_v50  ;;  %v2705_v62 = vmul.f32 %v913_v1, %v713_v18  ;;  %v2729_v18 = vadd.s32 %v2608_v24, %v1093_v41  ;;  %v1768_v32 = vpop.eup %1767 }
 0x1c9   : > { %1777 = vrcp.f32 %v1039_v40  ;;  %v2749_v50 = vadd.s32 %v2608_v24, %v1095_v21  ;;  %v1033_v40 = vadd.f32 %v2589_v55, %v2624_v19  ;;  %v2791_v19 = vmul.f32 %v1766_v14, %v2621_v11 }
 0x1ca   : > { %v1046_v22 = vsub.f32 %v1030_v43, %v2543_v52  ;;  %v1045_v60 = vsub.f32 %v1029_v7, %v2705_v62  ;;  %v1770_v43 = vpop.eup %1769  ;;  %vm1131_vm11 = vcmp.lt.s32.totalorder %v2729_v18, %v2626_v51  ;;  %v2796_v47 = vadd.s32 %v2608_v24, %v1100_v44 }
 0x1cb   : > { %v995_v54 = vpop.permute.xlu0 %994 }
 0x1cc   : > { %v1032_v46 = vadd.f32 %v2589_v55, %v995_v54  ;;  %1779 = vrcp.f32 %v1046_v22  ;;  %v1047_v54 = vsub.f32 %v1031_v3, %v2492_v33  ;;  %v2819_v3 = vmul.f32 %v1768_v32, %v2628_v29 }
 0x1cd   : > { %v2674_v35 = vpop.permute.xlu1 %1150  ;;  %1781 = vrcp.f32 %v1043_v59  ;;  %v2799_v59 = vadd.s32 80, %v2406_v13  ;;  %v1049_v29 = vsub.f32 %v1033_v40, %v2497_v23 }
 0x1ce   : > { %v1048_v0 = vsub.f32 %v1032_v46, %v2554_v63  ;;  %vm1229_vm8 = vcmp.eq.f32.partialorder %v2674_v35, %v2600_v20  ;;  %vm1213_vm15 = vcmp.gt.f32.partialorder %v2674_v35, %v2600_v20  ;;  %v1772_v15 = vpop.eup %1771 }
 0x1cf   : > { %v1005_v9 = vpop.permute.xlu0 %1004  ;;  %vm2760_vm5 = vmand %vm3315_vm2, %vm1229_vm8  ;;  %v2824_v35 = vmul.f32 %v1772_v15, %v2524_v5  ;;  %v2898_v11 = vadd.s32 %v2608_v24, %v2799_v59 }
 0x1d0   : > { %v1034_v39 = vadd.f32 %v2589_v55, %v1005_v9  ;;  %1783 = vrcp.f32 %v1048_v0  ;;  %v1774_v9 = vpop.eup %1773  ;;  %v2832_v0 = vmul.f32 %v1770_v43, %v2508_v8 }
 0x1d1   : > { %v1155_v37 = vpop.permute.xlu1 %1154  ;;  %1785 = vrcp.f32 %v1045_v60  ;;  %v1035_v60 = vadd.f32 %v2589_v55, %v2645_v42 }
 0x1d2   : > { %vm1230_vm7 = vcmp.eq.f32.partialorder %v1155_v37, %v2600_v20  ;;  %vm1214_vm12 = vcmp.gt.f32.partialorder %v1155_v37, %v2600_v20  ;;  %v1050_v22 = vsub.f32 %v1034_v39, %v2559_v12  ;;  %v1776_v7 = vpop.eup %1775  ;;  %1787 = vrcp.f32 %v1047_v54 }
 0x1d3   : > { %v1015_v34 = vpop.permute.xlu0 %1014  ;;  %vm2742_vm13 = vmand %vm3312_vm1, %vm1230_vm7  ;;  %v1778_v5 = vpop.eup %1777  ;;  %v2846_v16 = vmul.f32 %v1776_v7, %v2534_v49  ;;  %v1102_v54 = vadd.s32 120, %v2406_v13  ;;  %v1276_v4 = vsel %vm2771_vm0, %v2832_v0, -inf }
 0x1d4   : > { %v1036_v46 = vadd.f32 %v2589_v55, %v1015_v34  ;;  %vm2786_vm10 = vmor %vm1214_vm12, %vm2742_vm13  ;;  %1789 = vrcp.f32 %v1050_v22  ;;  %v2839_v34 = vmul.f32 %v1774_v9, %v2516_v61  ;;  %v2867_v42 = vmul.f32 %v1778_v5, %v2666_v27 }
 0x1d5   : > { %v1163_v58 = vpop.permute.xlu1 %1162  ;;  %v2912_v59 = vadd.s32 %v2608_v24, %v1102_v54 }
 0x1d6   : > { %vm1216_vm7 = vcmp.gt.f32.partialorder %v1163_v58, %v2600_v20  ;;  %vm1232_vm1 = vcmp.eq.f32.partialorder %v1163_v58, %v2600_v20  ;;  %v1052_v39 = vsub.f32 %v1036_v46, %v2567_v2  ;;  %v1780_v32 = vpop.eup %1779  ;;  %v1279_v49 = vsel %vm2786_vm10, %v2839_v34, -inf }
 0x1d7   : > { %vm1248_vm8 = vmand %vm3314_vm3, %vm1232_vm1  ;;  %v1782_v55 = vpop.eup %1781  ;;  %v2875_v40 = vmul.f32 %v1780_v32, %v2543_v52  ;;  %v1051_v46 = vsub.f32 %v1035_v60, %v2502_v26 }
 0x1d8   : > { %v1147_v41 = vpop.permute.xlu0 %1146  ;;  %vm2806_vm1 = vmor %vm1213_vm15, %vm2760_vm5  ;;  %vm1133_vm15 = vcmp.lt.s32.totalorder %v2749_v50, %v2626_v51  ;;  %1791 = vrcp.f32 %v1052_v39  ;;  %v2887_v28 = vmul.f32 %v1782_v55, %v2686_v17  ;;  %v1099_v17 = vadd.s32 96, %v2406_v13 }
 0x1d9   : > { %vm2812_vm12 = vmor %vm1216_vm7, %vm1248_vm8  ;;  %vm1212_vm13 = vcmp.gt.f32.partialorder %v1147_v41, %v2600_v20  ;;  %vm1228_vm3 = vcmp.eq.f32.partialorder %v1147_v41, %v2600_v20  ;;  %v1171_v21 = vpop.permute.xlu1 %1170  ;;  %1793 = vrcp.f32 %v1049_v29  ;;  %v1278_v29 = vsel %vm2806_vm1, %v2867_v42, -inf }
 0x1da   : > { %vm1244_vm5 = vmand %vm1126_vm4, %vm1228_vm3  ;;  %vm1218_vm7 = vcmp.gt.f32.partialorder %v1171_v21, %v2600_v20  ;;  %vm1234_vm8 = vcmp.eq.f32.partialorder %v1171_v21, %v2600_v20  ;;  %v1281_v14 = vsel %vm2812_vm12, %v2824_v35, -inf  ;;  %v1784_v22 = vpop.eup %1783  ;;  %1795 = vrcp.f32 %v1051_v46 }
 0x1db   : > { %vm1260_vm2 = vmor %vm1212_vm13, %vm1244_vm5  ;;  %v1786_v41 = vpop.eup %1785  ;;  %v2906_v5 = vmul.f32 %v1784_v22, %v2554_v63  ;;  %v3378_v50 = vmov (!%p1648_p8), 0 }
 0x1dc   : > { %v1277_v8 = vsel %vm1260_vm2, %v2791_v19, -inf  ;;  %vm1250_vm3 = vmand %vm3316_vm6, %vm1234_vm8  ;;  %v1159_v44 = vpop.permute.xlu0 %1158  ;;  %v1788_v21 = vpop.eup %1787  ;;  %v2920_v32 = vmul.f32 %v1786_v41, %v2705_v62 }
 0x1dd   : > { %v1293_v61 = vmax.f32 %v1277_v8, %v1281_v14  ;;  %vm1266_vm13 = vmor %vm1218_vm7, %vm1250_vm3  ;;  %vm1215_vm12 = vcmp.gt.f32.partialorder %v1159_v44, %v2600_v20  ;;  %vm1231_vm2 = vcmp.eq.f32.partialorder %v1159_v44, %v2600_v20  ;;  %v1179_v57 = vpop.permute.xlu1 %1178 }
 0x1de   : > { %v1283_v58 = vsel %vm1266_vm13, %v2846_v16, -inf  ;;  %vm1247_vm5 = vmand %vm1129_vm9, %vm1231_vm2  ;;  %vm1220_vm8 = vcmp.gt.f32.partialorder %v1179_v57, %v2600_v20  ;;  %vm1236_vm6 = vcmp.eq.f32.partialorder %v1179_v57, %v2600_v20  ;;  %v1790_v8 = vpop.eup %1789  ;;  %v1101_v57 = vadd.s32 112, %v2406_v13 }
 0x1df   : > { %v1295_v43 = vmax.f32 %v1279_v49, %v1283_v58  ;;  %vm1263_vm7 = vmor %vm1215_vm12, %vm1247_vm5  ;;  %v2935_v49 = vmul.f32 %v1790_v8, %v2559_v12 }
 0x1e0   : > { %v1280_v15 = vsel %vm1263_vm7, %v2819_v3, -inf  ;;  %vm1252_vm10 = vmand %vm1134_vm14, %vm1236_vm6  ;;  %v1167_v27 = vpop.permute.xlu0 %1166  ;;  %vm3348_vm7 = vcmp.lt.s32.totalorder %v2732_v31, %v2626_v51  ;;  %v2956_v22 = vadd.s32 %v2608_v24, %v1101_v57 }
 0x1e1   : > { %v1292_v9 = vmax.f32 %v1276_v4, %v1280_v15  ;;  %vm1268_vm3 = vmor %vm1220_vm8, %vm1252_vm10  ;;  %vm1217_vm13 = vcmp.gt.f32.partialorder %v1167_v27, %v2600_v20  ;;  %vm1233_vm0 = vcmp.eq.f32.partialorder %v1167_v27, %v2600_v20  ;;  %v1187_v1 = vpop.permute.xlu1 %1186  ;;  %vm3317_vm8 = vcmp.lt.s32.totalorder %v2796_v47, %v2626_v51 }
 0x1e2   : > { %v1285_v52 = vsel %vm1268_vm3, %v2875_v40, -inf  ;;  %vm1249_vm6 = vmand %vm1131_vm11, %vm1233_vm0  ;;  %vm1222_vm12 = vcmp.gt.f32.partialorder %v1187_v1, %v2600_v20  ;;  %vm1238_vm2 = vcmp.eq.f32.partialorder %v1187_v1, %v2600_v20  ;;  %v1792_v55 = vpop.eup %1791  ;;  %v2946_v15 = vmul.f32 %v1788_v21, %v2492_v33 }
 0x1e3   : > { %v1297_v7 = vmax.f32 %v1293_v61, %v1285_v52  ;;  %vm1265_vm5 = vmor %vm1217_vm13, %vm1249_vm6  ;;  %v2930_v61 = vadd.s32 %v2608_v24, %v1099_v17  ;;  %v1794_v4 = vpop.eup %1793  ;;  %v2960_v33 = vmul.f32 %v1792_v55, %v2567_v2  ;;  %v1934_v55 = vmov (!%p1648_p8), 0  }
 0x1e4   : > { %v1282_v39 = vsel %vm1265_vm5, %v2887_v28, -inf  ;;  %vm1254_vm10 = vmand %vm3348_vm7, %vm1238_vm2  ;;  %v1175_v14 = vpop.permute.xlu0 %1174  ;;  %vm1135_vm5 = vcmp.lt.s32.totalorder %v2898_v11, %v2626_v51  ;;  %v2969_v24 = vmul.f32 %v1794_v4, %v2497_v23  ;;  %v1796_v2 = vpop.eup %1795  ;;  %v3384_v11 = vmov (!%p1648_p8), 0 }
 0x1e5   : > { %v1294_v44 = vmax.f32 %v1278_v29, %v1282_v39  ;;  %vm1270_vm3 = vmor %vm1222_vm12, %vm1254_vm10  ;;  %vm1219_vm1 = vcmp.gt.f32.partialorder %v1175_v14, %v2600_v20  ;;  %vm1235_vm13 = vcmp.eq.f32.partialorder %v1175_v14, %v2600_v20  ;;  %v1195_v63 = vpop.permute.xlu1 %1194  ;;  %v2980_v23 = vmul.f32 %v1796_v2, %v2502_v26 }
 0x1e6   : > { %v1287_v37 = vsel %vm1270_vm3, %v2906_v5, -inf  ;;  %vm1251_vm0 = vmand %vm1133_vm15, %vm1235_vm13  ;;  %vm1224_vm6 = vcmp.gt.f32.partialorder %v1195_v63, %v2600_v20  ;;  %vm1240_vm2 = vcmp.eq.f32.partialorder %v1195_v63, %v2600_v20  ;;  %vm3318_vm13 = vcmp.lt.s32.totalorder %v2912_v59, %v2626_v51 }
 0x1e7   : > { %v1299_v60 = vmax.f32 %v1295_v43, %v1287_v37  ;;  %vm1267_vm12 = vmor %vm1219_vm1, %vm1251_vm0 }
 0x1e8   : > { %v1284_v62 = vsel %vm1267_vm12, %v2920_v32, -inf  ;;  %vm1256_vm7 = vmand %vm3317_vm8, %vm1240_vm2  ;;  %v1183_v58 = vpop.permute.xlu0 %1182 }
 0x1e9   : > { %v1296_v43 = vmax.f32 %v1292_v9, %v1284_v62  ;;  %vm1272_vm10 = vmor %vm1224_vm6, %vm1256_vm7  ;;  %vm1221_vm3 = vcmp.gt.f32.partialorder %v1183_v58, %v2600_v20  ;;  %vm1237_vm1 = vcmp.eq.f32.partialorder %v1183_v58, %v2600_v20  ;;  %v1203_v54 = vpop.permute.xlu1 %1202  ;;  %vm3320_vm7 = vcmp.lt.s32.totalorder %v2930_v61, %v2626_v51 }
 0x1ea   : > { %v1289_v12 = vsel %vm1272_vm10, %v2935_v49, -inf  ;;  %vm1253_vm0 = vmand %vm1135_vm5, %vm1237_vm1  ;;  %vm1226_vm6 = vcmp.gt.f32.partialorder %v1203_v54, %v2600_v20  ;;  %vm1242_vm2 = vcmp.eq.f32.partialorder %v1203_v54, %v2600_v20 }
 0x1eb   : > { %v1301_v27 = vmax.f32 %v1297_v7, %v1289_v12  ;;  %vm1269_vm12 = vmor %vm1221_vm3, %vm1253_vm0 }
 0x1ec   : > { %v1286_v46 = vsel %vm1269_vm12, %v2946_v15, -inf  ;;  %vm1258_vm10 = vmand %vm3318_vm13, %vm1242_vm2  ;;  %v1191_v9 = vpop.permute.xlu0 %1190  ;;  %vm3319_vm2 = vcmp.lt.s32.totalorder %v2956_v22, %v2626_v51 }
 0x1ed   : > { %v1298_v1 = vmax.f32 %v1294_v44, %v1286_v46  ;;  %vm1274_vm1 = vmor %vm1226_vm6, %vm1258_vm10  ;;  %vm1223_vm3 = vcmp.gt.f32.partialorder %v1191_v9, %v2600_v20  ;;  %vm1239_vm0 = vcmp.eq.f32.partialorder %v1191_v9, %v2600_v20 }
 0x1ee   : > { %v1291_v52 = vsel %vm1274_vm1, %v2960_v33, -inf  ;;  %vm1255_vm12 = vmand %vm3320_vm7, %vm1239_vm0  ;;  %vm3380_vm7 = vcmp.lt.s32.totalorder (!%p1648_p8), %v2732_v31, %v2626_v51  ;;  %v3387_v31 = vmov (!%p1648_p8), 0 }
 0x1ef   : > { %v1303_v41 = vmax.f32 %v1299_v60, %v1291_v52  ;;  %vm1271_vm8 = vmor %vm1223_vm3, %vm1255_vm12  ;;  %vm1322_vm12 = vcmp.lt.f32.partialorder (!%p1648_p8), %v2580_v53, 0.0 }
 0x1f0   : > { %v1288_v7 = vsel %vm1271_vm8, %v2969_v24, -inf  ;;  %v1199_v17 = vpop.permute.xlu0 %1198  ;;  %vm1323_vm8 = vcmp.eq.f32.partialorder (!%p1648_p8), %v2580_v53, 0.0  ;;  %v1346_v46 = vsel (!%p1648_p8), %vm1322_vm12, 1, %v1934_v55  ;;  %vm3364_vm12 = vcmp.lt.s32.totalorder (!%p1648_p8), %v2652_v56, %v2626_v51 }
 0x1f1   : > { %v1300_v21 = vmax.f32 %v1296_v43, %v1288_v7  ;;  %vm1225_vm6 = vcmp.gt.f32.partialorder %v1199_v17, %v2600_v20  ;;  %vm1241_vm10 = vcmp.eq.f32.partialorder %v1199_v17, %v2600_v20  ;;  %v1275_v20 = vld [vmem:[#allocation2] sm:$0x1]  ;;  %v1324_v43 = vsel (!%p1648_p8), %vm1323_vm8, 1, %v1934_v55 }
 0x1f2   : > { %vm1257_vm1 = vmand %vm3319_vm2, %vm1241_vm10  ;;  %v1328_v54 = vrot.slane (!%p1648_p8), %v1324_v43, %v2432_v45  ;;  %v1350_v25 = vrot.slane (!%p1648_p8), %v1346_v46, %v2432_v45  ;;  %v3372_v56 = vmov (!%p1648_p8), 0 }
 0x1f3   : > { %v1304_v29 = vmax.f32 %v1300_v21, %v1301_v27  ;;  %vm1273_vm3 = vmor %vm1225_vm6, %vm1257_vm1  ;;  %vm3351_vm6 = vcmp.lt.s32.totalorder (!%p1648_p8), %v2619_v48, %v2626_v51 }
 0x1f4   : > { %v1290_v39 = vsel %vm1273_vm3, %v2980_v23, -inf  ;;  %vm2989_vm0 = vcmp.eq.s32.totalorder (!%p1648_p8), %v1328_v54, 1  ;;  %vm3356_vm3 = vcmp.lt.s32.totalorder (!%p1648_p8), %v2641_v30, %v2626_v51 }
 0x1f5   : > { %v1302_v14 = vmax.f32 %v1298_v1, %v1290_v39  ;;  %vm2999_vm10 = vmand (!%p1648_p8), %vm3351_vm6, %vm2989_vm0  ;;  %vm3359_vm6 = vcmp.lt.s32.totalorder (!%p1648_p8), %v2635_v10, %v2626_v51 }
 0x1f6   : > { %vm3008_vm1 = vmand (!%p1648_p8), %vm1126_vm4, %vm2989_vm0 }
 0x1f7   : > { %v1305_v8 = vmax.f32 %v1302_v14, %v1303_v41  ;;  %vm3017_vm8 = vmand (!%p1648_p8), %vm3356_vm3, %vm2989_vm0 }
 0x1f8   : > { %vm3026_vm13 = vmand (!%p1648_p8), %vm3359_vm6, %vm2989_vm0  ;;  %vm3369_vm6 = vcmp.lt.s32.totalorder (!%p1648_p8), %v2679_v36, %v2626_v51 }
 0x1f9   : > { %v1306_v44 = vmax.f32 %v1304_v29, %v1305_v8  ;;  %vm3035_vm4 = vmand (!%p1648_p8), %vm1129_vm9, %vm2989_vm0 }
 0x1fa   : > { %vm3045_vm3 = vmand (!%p1648_p8), %vm3364_vm12, %vm2989_vm0 }
 0x1fb   : > { %v1307_v63 = vrot.slane %v1306_v44, 4  ;;  %vm3054_vm9 = vmand (!%p1648_p8), %vm1131_vm11, %vm2989_vm0  ;;  %vm3076_vm11 = vcmp.eq.s32.totalorder (!%p1648_p8), %v1350_v25, 1 }
 0x1fc   : > { %vm3063_vm2 = vmand (!%p1648_p8), %vm3369_vm6, %vm2989_vm0 }
 0x1fd   : > { %v1308_v37 = vmax.f32 %v1306_v44, %v1307_v63  ;;  %vm3072_vm12 = vmand (!%p1648_p8), %vm1133_vm15, %vm2989_vm0 }
 0x1fe   : > { %v3373_v56 = vsel (!%p1648_p8), %vm3072_vm12, 4294967295, %v3372_v56  ;;  %vm3085_vm6 = vmand (!%p1648_p8), %vm1134_vm14, %vm2989_vm0 }
 0x1ff   : > { %v1309_v60 = vrot.slane %v1308_v37, 2  ;;  %vm3094_vm15 = vmand (!%p1648_p8), %vm1135_vm5, %vm2989_vm0  ;;  %vm3383_vm5 = vcmp.lt.s32.totalorder (!%p1648_p8), %v2930_v61, %v2626_v51 }
 0x200   : > { %v3379_v50 = vsel (!%p1648_p8), %vm3094_vm15, 4294967295, %v3378_v50  ;;  %vm3103_vm12 = vmand (!%p1648_p8), %vm3380_vm7, %vm2989_vm0 }
 0x201   : > { %v1310_v57 = vmax.f32 %v1308_v37, %v1309_v60  ;;  %v3382_v6 = vsel (!%p1648_p8), %vm3103_vm12, 4294967295, %v3381_v6  ;;  %vm1352_vm14 = vmor (!%p1648_p8), %vm3076_vm11, %vm2999_vm10  ;;  %vm3386_vm12 = vcmp.lt.s32.totalorder (!%p1648_p8), %v2796_v47, %v2626_v51 }
 0x202   : > { %vm3116_vm15 = vmand (!%p1648_p8), %vm3383_vm5, %vm2989_vm0  ;;  %v1369_v47 = vsel (!%p1648_p8), %vm1352_vm14, %v2832_v0, inf }
 0x203   : > { %v1311_v62 = vrot.slane %v1310_v57, 1  ;;  %1321 = sbr.rel (%p1648_p8) target bundleno = 555 (0x22b), region = 44  ;;  %v3385_v11 = vsel (!%p1648_p8), %vm3116_vm15, 4294967295, %v3384_v11  ;;  %vm1353_vm7 = vmor (!%p1648_p8), %vm3076_vm11, %vm3008_vm1  ;;  %vm3389_vm15 = vcmp.lt.s32.totalorder (!%p1648_p8), %v2956_v22, %v2626_v51 }
 0x204   : > { %vm3129_vm10 = vmand (!%p1648_p8), %vm3386_vm12, %vm2989_vm0  ;;  %v1370_v22 = vsel (!%p1648_p8), %vm1353_vm7, %v2791_v19, inf }
 0x205   : > { %v1312_v58 = vmax.f32 %v1310_v57, %v1311_v62  ;;  %v3388_v31 = vsel (!%p1648_p8), %vm3129_vm10, 4294967295, %v3387_v31  ;;  %vm1354_vm5 = vmor (!%p1648_p8), %vm3076_vm11, %vm3017_vm8  ;;  %vm3392_vm8 = vcmp.lt.s32.totalorder (!%p1648_p8), %v2912_v59, %v2626_v51 }
 0x206   : > { %vm3142_vm1 = vmand (!%p1648_p8), %vm3389_vm15, %vm2989_vm0  ;;  %v1371_v0 = vsel (!%p1648_p8), %vm1354_vm5, %v2867_v42, inf  ;;  %vm3397_vm5 = vnez (!%p1648_p8), %v3382_v6 }
 0x207   : > { %v1313_v26 = vmax.f32 %v1275_v20, %v1312_v58  ;;  %vm1355_vm12 = vmor (!%p1648_p8), %vm3076_vm11, %vm3026_vm13  ;;  %v1368_v58 = vld [vmem:[#allocation3] sm:$0x1] (!%p1648_p8) }
 0x208   : > { %vm3156_vm10 = vmand (!%p1648_p8), %vm3392_vm8, %vm2989_vm0  ;;  %v1372_v59 = vsel (!%p1648_p8), %vm1355_vm12, %v2839_v34, inf }
 0x209   : > { %1314 = vst [vmem:[#allocation2] sm:$0x1] %v1313_v26  ;;  %vm1356_vm15 = vmor (!%p1648_p8), %vm3076_vm11, %vm3035_vm4 }
 0x20a   : > { %vm1357_vm13 = vmor %vm3076_vm11, %vm3045_vm3  ;;  %v1373_v51 = vsel %vm1356_vm15, %v2819_v3, inf  ;;  %vm3395_vm3 = vnez %v3373_v56  ;;  %vm3399_vm15 = vnez %v3388_v31 }
 0x20b   : > { %vm1358_vm0 = vmor %vm3076_vm11, %vm3054_vm9  ;;  %v1374_v1 = vsel %vm1357_vm13, %v2824_v35, inf  ;;  %v1385_v52 = vmin.f32 %v1369_v47, %v1373_v51 }
 0x20c   : > { %vm1359_vm4 = vmor %vm3076_vm11, %vm3063_vm2  ;;  %v1375_v19 = vsel %vm1358_vm0, %v2887_v28, inf  ;;  %v1386_v42 = vmin.f32 %v1370_v22, %v1374_v1  ;;  %vm3396_vm2 = vnez %v3379_v50 }
 0x20d   : > { %vm1360_vm14 = vmor %vm3076_vm11, %vm3395_vm3  ;;  %v1376_v3 = vsel %vm1359_vm4, %v2846_v16, inf  ;;  %v1387_v2 = vmin.f32 %v1371_v0, %v1375_v19 }
 0x20e   : > { %vm1361_vm9 = vmor %vm3076_vm11, %vm3085_vm6  ;;  %v1377_v35 = vsel %vm1360_vm14, %v2920_v32, inf  ;;  %v1388_v34 = vmin.f32 %v1372_v59, %v1376_v3  ;;  %vm3398_vm6 = vnez %v3385_v11 }
 0x20f   : > { %vm1362_vm7 = vmor %vm3076_vm11, %vm3396_vm2  ;;  %v1378_v28 = vsel %vm1361_vm9, %v2875_v40, inf  ;;  %v1389_v41 = vmin.f32 %v1385_v52, %v1377_v35 }
 0x210   : > { %vm1363_vm12 = vmor %vm3076_vm11, %vm3397_vm5  ;;  %v1379_v16 = vsel %vm1362_vm7, %v2946_v15, inf  ;;  %v1390_v7 = vmin.f32 %v1386_v42, %v1378_v28 }
 0x211   : > { %vm1364_vm8 = vmor %vm3076_vm11, %vm3398_vm6  ;;  %v1380_v32 = vsel %vm1363_vm12, %v2906_v5, inf  ;;  %v1391_v17 = vmin.f32 %v1387_v2, %v1379_v16 }
 0x212   : > { %vm1365_vm13 = vmor %vm3076_vm11, %vm3399_vm15  ;;  %v1381_v40 = vsel %vm1364_vm8, %v2969_v24, inf  ;;  %v1392_v21 = vmin.f32 %v1388_v34, %v1380_v32 }
 0x213   : > { %vm1366_vm0 = vmor %vm3076_vm11, %vm3142_vm1  ;;  %v1382_v15 = vsel %vm1365_vm13, %v2935_v49, inf  ;;  %v1393_v29 = vmin.f32 %v1389_v41, %v1381_v40 }
 0x214   : > { %vm1367_vm4 = vmor %vm3076_vm11, %vm3156_vm10  ;;  %v1383_v5 = vsel %vm1366_vm0, %v2980_v23, inf  ;;  %v1394_v39 = vmin.f32 %v1390_v7, %v1382_v15 }
 0x215   : > { %v1384_v14 = vsel %vm1367_vm4, %v2960_v33, inf  ;;  %v1395_v24 = vmin.f32 %v1391_v17, %v1383_v5 }
 0x216   : > { %v1396_v8 = vmin.f32 %v1392_v21, %v1384_v14  ;;  %v1397_v44 = vmin.f32 %v1393_v29, %v1394_v39 }
 0x218   : > { %v1398_v63 = vmin.f32 %v1395_v24, %v1396_v8 }
 0x21a   : > { %v1399_v37 = vmin.f32 %v1397_v44, %v1398_v63 }
 0x21c   : > { %v1400_v60 = vrot.slane %v1399_v37, 4 }
 0x21e   : > { %v1401_v57 = vmin.f32 %v1399_v37, %v1400_v60 }
 0x220   : > { %v1402_v62 = vrot.slane %v1401_v57, 2 }
 0x222   : > { %v1403_v49 = vmin.f32 %v1401_v57, %v1402_v62 }
 0x224   : > { %v1404_v20 = vrot.slane %v1403_v49, 1 }
 0x226   : > { %v1405_v26 = vmin.f32 %v1403_v49, %v1404_v20 }
 0x228   : > { %v1406_v55 = vmin.f32 %v1368_v58, %v1405_v26 }
 0x22a   : > { %1407 = vst [vmem:[#allocation3] sm:$0x1] %v1406_v55 }
 0x22b PF: > { %p1649_p9 = scmp.ne.s32.totalorder %s1898_s25, 3 }
 0x22c   : > { %v1935_v43 = vmov (!%p1649_p9), 1966171168   ;;  %v1414_v12 = vld [vmem:[%s2077_s21] sm:$0x1f] (!%p1649_p9) }
 0x22d   : > { %1411 = sbr.rel (%p1649_p9) target bundleno = 579 (0x243), region = 48  ;;  %v1425_v54 = vunpack.c.l.s4 (!%p1649_p9), %v1935_v43  ;;  %v1466_v46 = vcombine.high (!%p1649_p9), %v1414_v12, %v1414_v12 }
 0x22f   : > { %v1426_v4 = vunpack.c.0.s8 (!%p1649_p9), %v1425_v54 }
 0x231   : > { %v1412_v23 = vld [vmem:[#allocation2] sm:$0x1] (!%p1649_p9)  ;;  %v1413_v33 = vld [vmem:[#allocation3] sm:$0x1] (!%p1649_p9)  ;;  %v1429_v27 = vsub.s32 (!%p1649_p9), %v1426_v4, %v2406_v13 }
 0x232   : > { %vm1415_vm11 = vcmp.lt.f32.partialorder (!%p1649_p9), %v1412_v23, 0.5  ;;  %vm1416_vm10 = vcmp.ge.f32.partialorder (!%p1649_p9), %v1413_v33, 0.5  ;;  %vm1420_vm1 = vcmp.lt.f32.partialorder (!%p1649_p9), %v1412_v23, 0.6  ;;  %vm1421_vm3 = vcmp.ge.f32.partialorder (!%p1649_p9), %v1413_v33, 0.6 }
 0x233   : > { %vm3226_vm14 = vmand (!%p1649_p9), %vm1415_vm11, %vm1416_vm10  ;;  %v1430_v48 = vrot.slane (!%p1649_p9), %v1414_v12, %v1429_v27  ;;  %vm1449_vm9 = vcmp.lt.f32.partialorder (!%p1649_p9), %v1412_v23, 0.7  ;;  %vm1450_vm2 = vcmp.ge.f32.partialorder (!%p1649_p9), %v1413_v33, 0.7  ;;  %vm1456_vm7 = vcmp.lt.f32.partialorder (!%p1649_p9), %v1412_v23, 0.8 }
 0x234   : > { %vm3230_vm5 = vmand %vm1420_vm1, %vm1421_vm3  ;;  %vm1457_vm12 = vcmp.ge.f32.partialorder %v1413_v33, 0.8  ;;  %v1473_v38 = vrot.slane %v1466_v46, %v1429_v27  ;;  %v1418_v13 = vsel %vm3226_vm14, %v1414_v12, 0.0  ;;  %vm1463_vm8 = vcmp.lt.f32.partialorder %v1412_v23, 0.9 }
 0x235   : > { %v1431_v25 = vcombine.high %v1430_v48, %v1430_v48  ;;  %v1438_v10 = vrot.slane %v1430_v48, %v1429_v27  ;;  %vm1451_vm6 = vmand %vm1449_vm9, %vm1450_vm2  ;;  %vm1464_vm15 = vcmp.ge.f32.partialorder %v1413_v33, 0.9 }
 0x236   : > { %vm1458_vm13 = vmand %vm1456_vm7, %vm1457_vm12  ;;  %v1480_v6 = vrot.slane %v1473_v38, %v1429_v27 }
 0x237   : > { %v1445_v45 = vrot.slane %v1431_v25, %v1429_v27  ;;  %v1452_v56 = vcombine.high %v1438_v10, %v1438_v10  ;;  %vm1465_vm0 = vmand %vm1463_vm8, %vm1464_vm15 }
 0x238   : > { %v1482_v47 = vsel %vm1465_vm0, %v1480_v6, 0.0 }
 0x239   : > { %v1447_v18 = vsel %vm3230_vm5, %v1445_v45, 0.0  ;;  %v1454_v36 = vsel %vm1451_vm6, %v1452_v56, 0.0  ;;  %v1459_v50 = vcombine.high %v1445_v45, %v1445_v45 }
 0x23a   : > { %v1448_v11 = vadd.f32 %v1447_v18, %v1418_v13 }
 0x23b   : > { %v1461_v31 = vsel %vm1458_vm13, %v1459_v50, 0.0 }
 0x23c   : > { %v1455_v61 = vadd.f32 %v1454_v36, %v1448_v11 }
 0x23e   : > { %v1462_v9 = vadd.f32 %v1461_v31, %v1455_v61 }
 0x240   : > { %v1483_v22 = vadd.f32 %v1482_v47, %v1462_v9 }
 0x242   : > { %1484 = vst [vmem:[%s2086_s17] sm:$0x1] %v1483_v22 }
 0x243 PF: > { %s1651_s25 = sshll.u32 %s2469_s30, 4  ;;  %s1500_s7 = sshll.u32 %s2086_s17, 4  ;;  %s1501_s7 = int_to_ptr.vmem [resolvable:$true] %s1500_s7 }
 0x244   : > { %s3243_s20 = scalar_lea.hbm %s3304_s5, %s1651_s25  ;;  %s3404_s8 = sand.u32 1, %s1890_s24  }
 0x245   : > { %s1486_s14 = scalar_lea.sflag [#allocation7], %s3404_s8  ;;  %s1810_s21 = scalar_lea.vmem %s1501_s7, 16 }
 0x246   : > { %p1811_p10 = scmp.ne.s32.totalorder %s1501_s7, %s1810_s21  ;;  %s1936_s22 = smov [#allocation6]  }
 0x247   : > { %s1814_s15 = sshll.u32 %s1936_s22, 4  ;;  %s1815_s15 = int_to_ptr.vmem [resolvable:$false] %s1814_s15 }
 0x248   : > { %p1812_p13 = pnand %p1811_p10, %p2032_p11  ;;  %s1816_s16 = scalar_lea.vmem %s1815_s15, 32 }
 0x249   : > { %p1817_p1 = scmp.lt.s32.totalorder %s1501_s7, %s1815_s15  ;;  %p1818_p2 = scmp.lt.s32.totalorder %s1816_s16, %s1810_s21 }
 0x24a   : > { %p1813_p0 = pneg %p1812_p13 }
 0x24b   : > { %p1819_p3 = por %p1818_p2, %p1817_p1 }
 0x24d   : > { %p1820_p4 = pnand %p1819_p3, %p1813_p0 }
 0x24f   : > { %1823 = shalt.err (!%p1820_p4)
}
 0x250   : > { %s1824_s17 = scalar_lea.hbm %s3243_s20, 16  ;;  %s1828_s29 = scalar_lea.hbm %s3304_s5, 128 }
 0x251   : > { %p1825_p5 = scmp.ne.s32.totalorder %s3243_s20, %s1824_s17  ;;  %p1829_p8 = scmp.lt.u32.totalorder %s3243_s20, %s3304_s5 }
 0x252   : > { %p1830_p9 = scmp.lt.u32.totalorder %s1828_s29, %s1824_s17  ;;  %p1832_p13 = scmp.lt.u32.totalorder %s1824_s17, %s3243_s20 }
 0x253   : > { %p1826_p6 = pnand %p1825_p5, %p2032_p11 }
 0x254   : > { %p1831_p10 = por %p1830_p9, %p1829_p8 }
 0x255   : > { %p1827_p7 = pneg %p1826_p6 }
 0x256   : > { %p1833_p0 = por %p1832_p13, %p1831_p10 }
 0x258   : > { %p1834_p1 = pnand %p1833_p0, %p1827_p7 }
 0x25a   : > { %1837 = shalt.err (!%p1834_p1)
}
 0x25b   : > { %1654 = dma.vmem_to_hbm [thread:$0]  (%p2032_p11), %s1501_s7, 16, %s3243_s20, %s1486_s14  }
 0x25c PF: > { %p1660_p2 = scmp.ge.s32.totalorder %s1922_s6, 2  ;;  %s1512_s10 = sand.u32 1, %s1886_s23  }
 0x25d   : > { %s1513_s11 = scalar_lea.sflag [#allocation7], %s1512_s10 }
 0x25e   : > { %p1657_p3 = pnand %p1660_p2, %p2039_p12 }
 0x260   : > { %1881 = dma.done.wait (!%p1657_p3), %s1513_s11, 16  }
 0x261   : > { %1883 = vsyncadd (!%p1657_p3), %s1513_s11, 4294967280  ;;  %s24_s6 = sadd.s32 1, %s1922_s6   ;;  %s3406_s13 = sld [smem:[#allocation10_spill]] }
 0x262   : > { %p21_p4 = scmp.ge.s32.totalorder %s24_s6, 34   ;;  %s3407_s0 = sld [smem:[#allocation18_spill]] }
 0x263   : > { %s3408_s25 = sld [smem:[#allocation11_spill]]  ;;  %s3409_s26 = sld [smem:[#allocation12_spill]] }
 0x264   : > { %s3410_s27 = sld [smem:[#allocation13_spill]]  ;;  %s3411_s28 = sld [smem:[#allocation14_spill]] }
 0x265   : > { %s3412_s29 = sld [smem:[#allocation15_spill]]  ;;  %s3413_s30 = sld [smem:[#allocation17_spill]] }
 0x266   : > { %s3414_s23 = smov %s1890_s24  ;;  %23 = sbr.rel (!%p21_p4) target bundleno = 21 (0x15), region = 92 }
 0x267   : > { %s3415_s24 = smov %s3406_s13 }
 0x26d   :  { %1517 = vsyncpa [#allocation7], 1 }
 0x26e   :  { %1519 = vsyncpa [#allocation7 + $0x1], 1 }

</bundles_post_ra>
